<compile_context>
chip_gen: v5e
topology: v5e:2x2
jax: 0.10.0
libtpu: 0.0.40
codegen_flags: <defaults>
</compile_context>

<pallas_src>
import functools

import jax
import jax.numpy as jnp
from jax.experimental import pallas as pl
from jax.experimental.pallas import tpu as pltpu


def _sasi_mf_kernel(enc_ref, sent2_ref,
                    ws_ref, bs_ref,        # sent2_net : Linear(S, 256)
                    w_in_ref, b_in_ref,    # inp_l     : Linear(IN, H)
                    w1_ref, b1_ref,        # resid W1  : (L, H, H), (L, 1, H)
                    w2_ref, b2_ref,        # resid W2  : (L, H, H), (L, 1, H)
                    we_ref, be_ref,        # embedder  : (L, 256, H), (L, 1, H)
                    wc_ref, bc_ref,        # classifier: (H, TILE_N) bf16, (1, TILE_N) f32
                    out_ref,               # (N_ROWS, TILE_N) f32
                    *scratch,              # (x_scratch,) bf16 iff hoist_prelude
                    num_layers, hoist_prelude):
    f32 = jnp.float32

    def prelude():
        # sent2_net -> (1, 256) context; broadcasting over batch rows is
        # identical to PyTorch's .view(256) + broadcast add.
        c = jnp.dot(sent2_ref[...], ws_ref[...], preferred_element_type=f32) + bs_ref[...]
        x = jnp.dot(enc_ref[...], w_in_ref[...], preferred_element_type=f32) + b_in_ref[...]
        x = jnp.maximum(x, 0.0)
        for l in range(num_layers):        # statically unrolled; L is small
            h = jnp.maximum(
                jnp.dot(x, w1_ref[l], preferred_element_type=f32) + b1_ref[l], 0.0)
            # nn.Dropout -> identity in eval mode
            b = jnp.maximum(
                jnp.dot(h, w2_ref[l], preferred_element_type=f32) + b2_ref[l], 0.0)
            ctx = jnp.dot(c, we_ref[l], preferred_element_type=f32) + be_ref[l]  # (1, H)
            x = x + b + ctx
        # Single cast to the classifier's streaming dtype (bf16).
        return x.astype(wc_ref.dtype)

    if hoist_prelude:
        # Sequential ("arbitrary") grid: compute once, reuse from bf16 scratch.
        x_scratch = scratch[0]

        @pl.when(pl.program_id(0) == 0)
        def _():
            x_scratch[...] = prelude()

        x_bf16 = x_scratch[...]
    else:
        # Megacore mode: recompute the tiny prelude each step so the grid axis
        # can be "parallel"; its cost hides under the wc-tile DMA.
        x_bf16 = prelude()

    # Classifier tile: bf16 x bf16 -> f32 accumulate on the MXU.
    out_ref[...] = (
        jnp.dot(x_bf16, wc_ref[...], preferred_element_type=f32) + bc_ref[...]
    )


def _default_megacore():
    """Best-effort: enable the parallel (megacore) lowering only on v7x-class
    devices (2 TensorCores per chip).  On v5e/v6e it is a no-op, so keep the
    hoisted form there."""
    try:
        kind = jax.devices()[0].device_kind.lower()
        return "v7" in kind
    except Exception:  # pragma: no cover
        return False


def sasi_mf_forward(enc, sent2, params, num_layers, *,
                    tile_n=None, megacore=None, trim=False):
    """Fused forward.  Returns padded (N_ROWS, n_pad) logits by default
    (columns >= params['n_classes'] are exactly 0 and must be masked
    downstream); pass trim=True to get the exact (N_ROWS, n_classes) output.

    Throughput note: the bf16 classifier-weight stream and per-call overhead
    are paid per invocation — batch as many rows as possible per call."""
    if megacore is None:
        megacore = _default_megacore()
    if tile_n is None:
        tile_n = 2560 if megacore else 5120   # 4 steps (2/core on v7x) vs 2 steps

    n_rows = enc.shape[0]
    hidden = params["w_in"].shape[1]
    wc = params["wc"]            # already bf16, lane/tile padded: (H, n_pad)
    bc = params["bc"]            # already f32,  padded: (1, n_pad)
    n_pad = wc.shape[1]
    n_classes = params["n_classes"]
    assert n_pad % tile_n == 0, (n_pad, tile_n)
    n_tiles = n_pad // tile_n

    args = (enc, sent2,
            params["ws"], params["bs"],
            params["w_in"], params["b_in"],
            params["w1"], params["b1"],
            params["w2"], params["b2"],
            params["we"], params["be"],
            wc, bc)

    def resident_spec(a):
        # Full-array block, constant index_map -> DMA'd once, VMEM-resident.
        nd = a.ndim
        return pl.BlockSpec(a.shape, lambda i, _nd=nd: (0,) * _nd)

    in_specs = [resident_spec(a) for a in args[:-2]]
    in_specs += [
        pl.BlockSpec((hidden, tile_n), lambda i: (0, i)),   # wc tiles over N
        pl.BlockSpec((1, tile_n), lambda i: (0, i)),        # bc tiles over N
    ]
    out_spec = pl.BlockSpec((n_rows, tile_n), lambda i: (0, i))
    out_shape = jax.ShapeDtypeStruct((n_rows, n_pad), jnp.float32)

    hoist = not megacore
    scratch_shapes = ([pltpu.VMEM((n_rows, hidden), jnp.bfloat16)]
                      if hoist else [])

    out_pad = pl.pallas_call(
        functools.partial(_sasi_mf_kernel, num_layers=num_layers,
                          hoist_prelude=hoist),
        grid=(n_tiles,),
        in_specs=in_specs,
        out_specs=out_spec,
        out_shape=out_shape,
        scratch_shapes=scratch_shapes,
        compiler_params=pltpu.CompilerParams(
            dimension_semantics=("arbitrary",) if hoist else ("parallel",)),
    )(*args)

    if trim:
        return out_pad[:, :n_classes]
    return out_pad


def _linear_init(key, fan_in, fan_out):
    """PyTorch-style Linear init; weight stored already transposed (in, out)."""
    kw, kb = jax.random.split(key)
    bound = 1.0 / (fan_in ** 0.5)
    w = jax.random.uniform(kw, (fan_in, fan_out), jnp.float32, -bound, bound)
    b = jax.random.uniform(kb, (1, fan_out), jnp.float32, -bound, bound)
    return w, b


def make_params(key, *, sent2_dim, inp_size, hidden, num_layers, n_classes,
                pad_multiple=5120):
    """Build parameters.  The classifier weight/bias are prepped ONCE here:
    wc cast to bf16 and padded to a multiple of `pad_multiple` (so both the
    2560- and 5120-wide tilings divide it evenly); bc padded to match.  The
    raw f32 classifier params are kept under wc_ref/bc_ref for references."""
    keys = jax.random.split(key, 3 + 2 * num_layers)
    ws, bs = _linear_init(keys[0], sent2_dim, 256)          # sent2_net
    w_in, b_in = _linear_init(keys[1], inp_size, hidden)    # inp_l
    wc, bc = _linear_init(keys[2], hidden, n_classes)       # classifier

    n_pad = pl.cdiv(n_classes, pad_multiple) * pad_multiple
    pad = n_pad - n_classes
    wc_prepped = jnp.pad(wc.astype(jnp.bfloat16), ((0, 0), (0, pad)))
    bc_prepped = jnp.pad(bc, ((0, 0), (0, pad)))

    w1s, b1s, w2s, b2s = [], [], [], []
    for l in range(num_layers):
        w1, b1 = _linear_init(keys[3 + 2 * l], hidden, hidden)
        w2, b2 = _linear_init(keys[4 + 2 * l], hidden, hidden)
        w1s.append(w1); b1s.append(b1); w2s.append(w2); b2s.append(b2)

    return dict(
        ws=ws, bs=bs,
        w_in=w_in, b_in=b_in,
        w1=jnp.stack(w1s), b1=jnp.stack(b1s),   # (L, H, H), (L, 1, H)
        w2=jnp.stack(w2s), b2=jnp.stack(b2s),
        # embedder is explicitly zero-initialized in ContextResidLayer.__init__
        we=jnp.zeros((num_layers, 256, hidden), jnp.float32),
        be=jnp.zeros((num_layers, 1, hidden), jnp.float32),
        wc=wc_prepped, bc=bc_prepped,            # kernel-ready (bf16 / padded)
        wc_ref=wc, bc_ref=bc,                    # raw f32 (for reference only)
        n_classes=n_classes,
    )


def reference(enc, sent2, p, num_layers, *, classifier_dtype=jnp.float32):
    c = sent2 @ p["ws"] + p["bs"]
    x = jax.nn.relu(enc @ p["w_in"] + p["b_in"])
    for l in range(num_layers):
        h = jax.nn.relu(x @ p["w1"][l] + p["b1"][l])
        b = jax.nn.relu(h @ p["w2"][l] + p["b2"][l])
        x = x + b + (c @ p["we"][l] + p["be"][l])
    return jnp.dot(x.astype(classifier_dtype), p["wc_ref"].astype(classifier_dtype),
                   preferred_element_type=jnp.float32) + p["bc_ref"]


if __name__ == "__main__":
    # small config consistent with the module:
    #   predictors = ['loc', 'env'] -> inp_size = 4 + 20 = 24
    #   sinr_hidden = 32, sinr_layers = 2, classifier output = 10040 (hard-coded)
    N_ROWS, INP, SENT2_DIM, HIDDEN, LAYERS, N_CLASSES = 8, 24, 16, 32, 2, 10040

    root = jax.random.PRNGKey(0)
    k_enc, k_sent2, k_params = jax.random.split(root, 3)

    enc = jax.random.normal(k_enc, (N_ROWS, INP), jnp.float32)
    sent2 = jax.random.normal(k_sent2, (1, SENT2_DIM), jnp.float32)  # batch 1 -> view(256) path
    params = make_params(k_params, sent2_dim=SENT2_DIM, inp_size=INP,
                         hidden=HIDDEN, num_layers=LAYERS, n_classes=N_CLASSES)

    # Reference mirrors the kernel's bf16 classifier-weight quantization
    # (activations and accumulation remain f32 in both).
    ref = reference(enc, sent2, params, LAYERS, classifier_dtype=jnp.bfloat16)

    ok = True
    # Exercise both lowerings: hoisted/sequential (v5e/v6e) and per-step/parallel (v7x).
    for megacore in (False, True):
        out_pad = sasi_mf_forward(enc, sent2, params, LAYERS, megacore=megacore)
        out_pad = jax.block_until_ready(out_pad)
        n_pad = params["wc"].shape[1]
        ok &= out_pad.shape == (N_ROWS, n_pad)
        # Padded columns (>= N_CLASSES) are exactly 0 (zero weight, zero bias).
        ok &= bool(jnp.all(out_pad[:, N_CLASSES:] == 0.0))
        # Valid columns match the reference.
        ok &= bool(jnp.allclose(out_pad[:, :N_CLASSES], ref, atol=1e-2, rtol=1e-2))

    # Trimmed path (exact PyTorch output width) still available when needed.
    out_trim = jax.block_until_ready(
        sasi_mf_forward(enc, sent2, params, LAYERS, megacore=False, trim=True))
    ok &= out_trim.shape == (N_ROWS, N_CLASSES)
    ok &= bool(jnp.allclose(out_trim, ref, atol=1e-2, rtol=1e-2))

    assert ok, "mismatch vs reference"
    print("KERNEL_OK")
</pallas_src>

<mosaic_0001>
module attributes {stable_mosaic.version = 11 : i64} {
  func.func @_sasi_mf_kernel(%arg0: i32, %arg1: memref<8x24xf32, #tpu.memory_space<vmem>>, %arg2: memref<1x16xf32, #tpu.memory_space<vmem>>, %arg3: memref<16x256xf32, #tpu.memory_space<vmem>>, %arg4: memref<1x256xf32, #tpu.memory_space<vmem>>, %arg5: memref<24x32xf32, #tpu.memory_space<vmem>>, %arg6: memref<1x32xf32, #tpu.memory_space<vmem>>, %arg7: memref<2x32x32xf32, #tpu.memory_space<vmem>>, %arg8: memref<2x1x32xf32, #tpu.memory_space<vmem>>, %arg9: memref<2x32x32xf32, #tpu.memory_space<vmem>>, %arg10: memref<2x1x32xf32, #tpu.memory_space<vmem>>, %arg11: memref<2x256x32xf32, #tpu.memory_space<vmem>>, %arg12: memref<2x1x32xf32, #tpu.memory_space<vmem>>, %arg13: memref<32x5120xbf16, #tpu.memory_space<vmem>>, %arg14: memref<1x5120xf32, #tpu.memory_space<vmem>>, %arg15: memref<8x5120xf32, #tpu.memory_space<vmem>>, %arg16: memref<8x32xbf16, #tpu.memory_space<vmem>>) attributes {dimension_semantics = [#tpu.dimension_semantics<arbitrary>], iteration_bounds = array<i64: 2>, scalar_prefetch = 0 : i64, scratch_operands = 1 : i64, tpu.core_type = #tpu.core_type<tc>, window_params = [{pipeline_mode = #tpu.pipeline_mode<synchronous>, transform_indices = @transform_0, window_bounds = array<i64: 8, 24>}, {pipeline_mode = #tpu.pipeline_mode<synchronous>, transform_indices = @transform_1, window_bounds = array<i64: 1, 16>}, {pipeline_mode = #tpu.pipeline_mode<synchronous>, transform_indices = @transform_2, window_bounds = array<i64: 16, 256>}, {pipeline_mode = #tpu.pipeline_mode<synchronous>, transform_indices = @transform_3, window_bounds = array<i64: 1, 256>}, {pipeline_mode = #tpu.pipeline_mode<synchronous>, transform_indices = @transform_4, window_bounds = array<i64: 24, 32>}, {pipeline_mode = #tpu.pipeline_mode<synchronous>, transform_indices = @transform_5, window_bounds = array<i64: 1, 32>}, {pipeline_mode = #tpu.pipeline_mode<synchronous>, transform_indices = @transform_6, window_bounds = array<i64: 2, 32, 32>}, {pipeline_mode = #tpu.pipeline_mode<synchronous>, transform_indices = @transform_7, window_bounds = array<i64: 2, 1, 32>}, {pipeline_mode = #tpu.pipeline_mode<synchronous>, transform_indices = @transform_8, window_bounds = array<i64: 2, 32, 32>}, {pipeline_mode = #tpu.pipeline_mode<synchronous>, transform_indices = @transform_9, window_bounds = array<i64: 2, 1, 32>}, {pipeline_mode = #tpu.pipeline_mode<synchronous>, transform_indices = @transform_10, window_bounds = array<i64: 2, 256, 32>}, {pipeline_mode = #tpu.pipeline_mode<synchronous>, transform_indices = @transform_11, window_bounds = array<i64: 2, 1, 32>}, {transform_indices = @transform_12, window_bounds = array<i64: 32, 5120>}, {transform_indices = @transform_13, window_bounds = array<i64: 1, 5120>}, {transform_indices = @transform_14, window_bounds = array<i64: 8, 5120>}]} {
    %c0_i32 = arith.constant 0 : i32
    %0 = arith.cmpi eq, %arg0, %c0_i32 : i32
    %1 = arith.extui %0 : i1 to i32
    %c0_i32_0 = arith.constant 0 : i32
    %2 = arith.cmpi ne, %1, %c0_i32_0 : i32
    scf.if %2 {
      %c0_8 = arith.constant 0 : index
      %c0_9 = arith.constant 0 : index
      %10 = vector.load %arg2[%c0_8, %c0_9] : memref<1x16xf32, #tpu.memory_space<vmem>>, vector<1x16xf32>
      %c0_10 = arith.constant 0 : index
      %c0_11 = arith.constant 0 : index
      %11 = vector.load %arg3[%c0_10, %c0_11] : memref<16x256xf32, #tpu.memory_space<vmem>>, vector<16x256xf32>
      %cst_12 = arith.constant dense<0.000000e+00> : vector<1x256xf32>
      %12 = tpu.matmul %10, %11, %cst_12 {dimension_numbers = #tpu.dot_dimension_numbers<[1], [0], [0], [1], [0, 0, 1, 1], [], []>} : vector<1x16xf32>, vector<16x256xf32>, vector<1x256xf32> -> vector<1x256xf32>
      %c0_13 = arith.constant 0 : index
      %c0_14 = arith.constant 0 : index
      %13 = vector.load %arg4[%c0_13, %c0_14] : memref<1x256xf32, #tpu.memory_space<vmem>>, vector<1x256xf32>
      %14 = arith.addf %12, %13 : vector<1x256xf32>
      %c0_15 = arith.constant 0 : index
      %c0_16 = arith.constant 0 : index
      %15 = vector.load %arg1[%c0_15, %c0_16] : memref<8x24xf32, #tpu.memory_space<vmem>>, vector<8x24xf32>
      %c0_17 = arith.constant 0 : index
      %c0_18 = arith.constant 0 : index
      %16 = vector.load %arg5[%c0_17, %c0_18] : memref<24x32xf32, #tpu.memory_space<vmem>>, vector<24x32xf32>
      %cst_19 = arith.constant dense<0.000000e+00> : vector<8x32xf32>
      %17 = tpu.matmul %15, %16, %cst_19 {dimension_numbers = #tpu.dot_dimension_numbers<[1], [0], [0], [1], [0, 0, 1, 1], [], []>} : vector<8x24xf32>, vector<24x32xf32>, vector<8x32xf32> -> vector<8x32xf32>
      %c0_20 = arith.constant 0 : index
      %c0_21 = arith.constant 0 : index
      %18 = vector.load %arg6[%c0_20, %c0_21] : memref<1x32xf32, #tpu.memory_space<vmem>>, vector<1x32xf32>
      %19 = vector.broadcast %18 : vector<1x32xf32> to vector<8x32xf32>
      %20 = arith.addf %17, %19 : vector<8x32xf32>
      %cst_22 = arith.constant 0.000000e+00 : f32
      %21 = vector.broadcast %cst_22 : f32 to vector<8x32xf32>
      %22 = arith.maximumf %20, %21 : vector<8x32xf32>
      %c0_23 = arith.constant 0 : index
      %c0_24 = arith.constant 0 : index
      %c0_25 = arith.constant 0 : index
      %23 = vector.load %arg7[%c0_23, %c0_24, %c0_25] : memref<2x32x32xf32, #tpu.memory_space<vmem>>, vector<1x32x32xf32>
      %24 = vector.shape_cast %23 : vector<1x32x32xf32> to vector<32x32xf32>
      %cst_26 = arith.constant dense<0.000000e+00> : vector<8x32xf32>
      %25 = tpu.matmul %22, %24, %cst_26 {dimension_numbers = #tpu.dot_dimension_numbers<[1], [0], [0], [1], [0, 0, 1, 1], [], []>} : vector<8x32xf32>, vector<32x32xf32>, vector<8x32xf32> -> vector<8x32xf32>
      %c0_27 = arith.constant 0 : index
      %c0_28 = arith.constant 0 : index
      %c0_29 = arith.constant 0 : index
      %26 = vector.load %arg8[%c0_27, %c0_28, %c0_29] : memref<2x1x32xf32, #tpu.memory_space<vmem>>, vector<1x1x32xf32>
      %27 = vector.shape_cast %26 : vector<1x1x32xf32> to vector<1x32xf32>
      %28 = vector.broadcast %27 : vector<1x32xf32> to vector<8x32xf32>
      %29 = arith.addf %25, %28 : vector<8x32xf32>
      %cst_30 = arith.constant 0.000000e+00 : f32
      %30 = vector.broadcast %cst_30 : f32 to vector<8x32xf32>
      %31 = arith.maximumf %29, %30 : vector<8x32xf32>
      %c0_31 = arith.constant 0 : index
      %c0_32 = arith.constant 0 : index
      %c0_33 = arith.constant 0 : index
      %32 = vector.load %arg9[%c0_31, %c0_32, %c0_33] : memref<2x32x32xf32, #tpu.memory_space<vmem>>, vector<1x32x32xf32>
      %33 = vector.shape_cast %32 : vector<1x32x32xf32> to vector<32x32xf32>
      %cst_34 = arith.constant dense<0.000000e+00> : vector<8x32xf32>
      %34 = tpu.matmul %31, %33, %cst_34 {dimension_numbers = #tpu.dot_dimension_numbers<[1], [0], [0], [1], [0, 0, 1, 1], [], []>} : vector<8x32xf32>, vector<32x32xf32>, vector<8x32xf32> -> vector<8x32xf32>
      %c0_35 = arith.constant 0 : index
      %c0_36 = arith.constant 0 : index
      %c0_37 = arith.constant 0 : index
      %35 = vector.load %arg10[%c0_35, %c0_36, %c0_37] : memref<2x1x32xf32, #tpu.memory_space<vmem>>, vector<1x1x32xf32>
      %36 = vector.shape_cast %35 : vector<1x1x32xf32> to vector<1x32xf32>
      %37 = vector.broadcast %36 : vector<1x32xf32> to vector<8x32xf32>
      %38 = arith.addf %34, %37 : vector<8x32xf32>
      %cst_38 = arith.constant 0.000000e+00 : f32
      %39 = vector.broadcast %cst_38 : f32 to vector<8x32xf32>
      %40 = arith.maximumf %38, %39 : vector<8x32xf32>
      %c0_39 = arith.constant 0 : index
      %c0_40 = arith.constant 0 : index
      %c0_41 = arith.constant 0 : index
      %41 = vector.load %arg11[%c0_39, %c0_40, %c0_41] : memref<2x256x32xf32, #tpu.memory_space<vmem>>, vector<1x256x32xf32>
      %42 = vector.shape_cast %41 : vector<1x256x32xf32> to vector<256x32xf32>
      %cst_42 = arith.constant dense<0.000000e+00> : vector<1x32xf32>
      %43 = tpu.matmul %14, %42, %cst_42 {dimension_numbers = #tpu.dot_dimension_numbers<[1], [0], [0], [1], [0, 0, 1, 1], [], []>} : vector<1x256xf32>, vector<256x32xf32>, vector<1x32xf32> -> vector<1x32xf32>
      %c0_43 = arith.constant 0 : index
      %c0_44 = arith.constant 0 : index
      %c0_45 = arith.constant 0 : index
      %44 = vector.load %arg12[%c0_43, %c0_44, %c0_45] : memref<2x1x32xf32, #tpu.memory_space<vmem>>, vector<1x1x32xf32>
      %45 = vector.shape_cast %44 : vector<1x1x32xf32> to vector<1x32xf32>
      %46 = arith.addf %43, %45 : vector<1x32xf32>
      %47 = arith.addf %22, %40 : vector<8x32xf32>
      %48 = vector.broadcast %46 : vector<1x32xf32> to vector<8x32xf32>
      %49 = arith.addf %47, %48 : vector<8x32xf32>
      %c1 = arith.constant 1 : index
      %c0_46 = arith.constant 0 : index
      %c0_47 = arith.constant 0 : index
      %50 = vector.load %arg7[%c1, %c0_46, %c0_47] : memref<2x32x32xf32, #tpu.memory_space<vmem>>, vector<1x32x32xf32>
      %51 = vector.shape_cast %50 : vector<1x32x32xf32> to vector<32x32xf32>
      %cst_48 = arith.constant dense<0.000000e+00> : vector<8x32xf32>
      %52 = tpu.matmul %49, %51, %cst_48 {dimension_numbers = #tpu.dot_dimension_numbers<[1], [0], [0], [1], [0, 0, 1, 1], [], []>} : vector<8x32xf32>, vector<32x32xf32>, vector<8x32xf32> -> vector<8x32xf32>
      %c1_49 = arith.constant 1 : index
      %c0_50 = arith.constant 0 : index
      %c0_51 = arith.constant 0 : index
      %53 = vector.load %arg8[%c1_49, %c0_50, %c0_51] : memref<2x1x32xf32, #tpu.memory_space<vmem>>, vector<1x1x32xf32>
      %54 = vector.shape_cast %53 : vector<1x1x32xf32> to vector<1x32xf32>
      %55 = vector.broadcast %54 : vector<1x32xf32> to vector<8x32xf32>
      %56 = arith.addf %52, %55 : vector<8x32xf32>
      %cst_52 = arith.constant 0.000000e+00 : f32
      %57 = vector.broadcast %cst_52 : f32 to vector<8x32xf32>
      %58 = arith.maximumf %56, %57 : vector<8x32xf32>
      %c1_53 = arith.constant 1 : index
      %c0_54 = arith.constant 0 : index
      %c0_55 = arith.constant 0 : index
      %59 = vector.load %arg9[%c1_53, %c0_54, %c0_55] : memref<2x32x32xf32, #tpu.memory_space<vmem>>, vector<1x32x32xf32>
      %60 = vector.shape_cast %59 : vector<1x32x32xf32> to vector<32x32xf32>
      %cst_56 = arith.constant dense<0.000000e+00> : vector<8x32xf32>
      %61 = tpu.matmul %58, %60, %cst_56 {dimension_numbers = #tpu.dot_dimension_numbers<[1], [0], [0], [1], [0, 0, 1, 1], [], []>} : vector<8x32xf32>, vector<32x32xf32>, vector<8x32xf32> -> vector<8x32xf32>
      %c1_57 = arith.constant 1 : index
      %c0_58 = arith.constant 0 : index
      %c0_59 = arith.constant 0 : index
      %62 = vector.load %arg10[%c1_57, %c0_58, %c0_59] : memref<2x1x32xf32, #tpu.memory_space<vmem>>, vector<1x1x32xf32>
      %63 = vector.shape_cast %62 : vector<1x1x32xf32> to vector<1x32xf32>
      %64 = vector.broadcast %63 : vector<1x32xf32> to vector<8x32xf32>
      %65 = arith.addf %61, %64 : vector<8x32xf32>
      %cst_60 = arith.constant 0.000000e+00 : f32
      %66 = vector.broadcast %cst_60 : f32 to vector<8x32xf32>
      %67 = arith.maximumf %65, %66 : vector<8x32xf32>
      %c1_61 = arith.constant 1 : index
      %c0_62 = arith.constant 0 : index
      %c0_63 = arith.constant 0 : index
      %68 = vector.load %arg11[%c1_61, %c0_62, %c0_63] : memref<2x256x32xf32, #tpu.memory_space<vmem>>, vector<1x256x32xf32>
      %69 = vector.shape_cast %68 : vector<1x256x32xf32> to vector<256x32xf32>
      %cst_64 = arith.constant dense<0.000000e+00> : vector<1x32xf32>
      %70 = tpu.matmul %14, %69, %cst_64 {dimension_numbers = #tpu.dot_dimension_numbers<[1], [0], [0], [1], [0, 0, 1, 1], [], []>} : vector<1x256xf32>, vector<256x32xf32>, vector<1x32xf32> -> vector<1x32xf32>
      %c1_65 = arith.constant 1 : index
      %c0_66 = arith.constant 0 : index
      %c0_67 = arith.constant 0 : index
      %71 = vector.load %arg12[%c1_65, %c0_66, %c0_67] : memref<2x1x32xf32, #tpu.memory_space<vmem>>, vector<1x1x32xf32>
      %72 = vector.shape_cast %71 : vector<1x1x32xf32> to vector<1x32xf32>
      %73 = arith.addf %70, %72 : vector<1x32xf32>
      %74 = arith.addf %49, %67 : vector<8x32xf32>
      %75 = vector.broadcast %73 : vector<1x32xf32> to vector<8x32xf32>
      %76 = arith.addf %74, %75 : vector<8x32xf32>
      %77 = arith.truncf %76 : vector<8x32xf32> to vector<8x32xbf16>
      %c0_68 = arith.constant 0 : index
      %c0_69 = arith.constant 0 : index
      %78 = vector.load %arg16[%c0_68, %c0_69] : memref<8x32xbf16, #tpu.memory_space<vmem>>, vector<8x32xbf16>
      tpu.vector_store %arg16[%c0_68, %c0_69], %77 {strides = array<i32>} : memref<8x32xbf16, #tpu.memory_space<vmem>>, vector<8x32xbf16>,
    } else {
    }
    %c0 = arith.constant 0 : index
    %c0_1 = arith.constant 0 : index
    %3 = vector.load %arg16[%c0, %c0_1] : memref<8x32xbf16, #tpu.memory_space<vmem>>, vector<8x32xbf16>
    %c0_2 = arith.constant 0 : index
    %c0_3 = arith.constant 0 : index
    %4 = vector.load %arg13[%c0_2, %c0_3] : memref<32x5120xbf16, #tpu.memory_space<vmem>>, vector<32x5120xbf16>
    %cst = arith.constant dense<0.000000e+00> : vector<8x5120xf32>
    %5 = tpu.matmul %3, %4, %cst {dimension_numbers = #tpu.dot_dimension_numbers<[1], [0], [0], [1], [0, 0, 1, 1], [], []>} : vector<8x32xbf16>, vector<32x5120xbf16>, vector<8x5120xf32> -> vector<8x5120xf32>
    %c0_4 = arith.constant 0 : index
    %c0_5 = arith.constant 0 : index
    %6 = vector.load %arg14[%c0_4, %c0_5] : memref<1x5120xf32, #tpu.memory_space<vmem>>, vector<1x5120xf32>
    %7 = vector.broadcast %6 : vector<1x5120xf32> to vector<8x5120xf32>
    %8 = arith.addf %5, %7 : vector<8x5120xf32>
    %c0_6 = arith.constant 0 : index
    %c0_7 = arith.constant 0 : index
    %9 = vector.load %arg15[%c0_6, %c0_7] : memref<8x5120xf32, #tpu.memory_space<vmem>>, vector<8x5120xf32>
    tpu.vector_store %arg15[%c0_6, %c0_7], %8 {strides = array<i32>} : memref<8x5120xf32, #tpu.memory_space<vmem>>, vector<8x5120xf32>,
    return
  }
  func.func @transform_0(%arg0: i32) -> (i32, i32) {
    %c0_i32 = arith.constant 0 : i32
    %c0_i32_0 = arith.constant 0 : i32
    %c0_i32_1 = arith.constant 0 : i32
    return %c0_i32, %c0_i32_0 : i32, i32
  }
  func.func @transform_1(%arg0: i32) -> (i32, i32) {
    %c0_i32 = arith.constant 0 : i32
    %c0_i32_0 = arith.constant 0 : i32
    %c0_i32_1 = arith.constant 0 : i32
    return %c0_i32, %c0_i32_0 : i32, i32
  }
  func.func @transform_2(%arg0: i32) -> (i32, i32) {
    %c0_i32 = arith.constant 0 : i32
    %c0_i32_0 = arith.constant 0 : i32
    %c0_i32_1 = arith.constant 0 : i32
    return %c0_i32, %c0_i32_0 : i32, i32
  }
  func.func @transform_3(%arg0: i32) -> (i32, i32) {
    %c0_i32 = arith.constant 0 : i32
    %c0_i32_0 = arith.constant 0 : i32
    %c0_i32_1 = arith.constant 0 : i32
    return %c0_i32, %c0_i32_0 : i32, i32
  }
  func.func @transform_4(%arg0: i32) -> (i32, i32) {
    %c0_i32 = arith.constant 0 : i32
    %c0_i32_0 = arith.constant 0 : i32
    %c0_i32_1 = arith.constant 0 : i32
    return %c0_i32, %c0_i32_0 : i32, i32
  }
  func.func @transform_5(%arg0: i32) -> (i32, i32) {
    %c0_i32 = arith.constant 0 : i32
    %c0_i32_0 = arith.constant 0 : i32
    %c0_i32_1 = arith.constant 0 : i32
    return %c0_i32, %c0_i32_0 : i32, i32
  }
  func.func @transform_6(%arg0: i32) -> (i32, i32, i32) {
    %c0_i32 = arith.constant 0 : i32
    %c0_i32_0 = arith.constant 0 : i32
    %c0_i32_1 = arith.constant 0 : i32
    %c0_i32_2 = arith.constant 0 : i32
    return %c0_i32, %c0_i32_0, %c0_i32_1 : i32, i32, i32
  }
  func.func @transform_7(%arg0: i32) -> (i32, i32, i32) {
    %c0_i32 = arith.constant 0 : i32
    %c0_i32_0 = arith.constant 0 : i32
    %c0_i32_1 = arith.constant 0 : i32
    %c0_i32_2 = arith.constant 0 : i32
    return %c0_i32, %c0_i32_0, %c0_i32_1 : i32, i32, i32
  }
  func.func @transform_8(%arg0: i32) -> (i32, i32, i32) {
    %c0_i32 = arith.constant 0 : i32
    %c0_i32_0 = arith.constant 0 : i32
    %c0_i32_1 = arith.constant 0 : i32
    %c0_i32_2 = arith.constant 0 : i32
    return %c0_i32, %c0_i32_0, %c0_i32_1 : i32, i32, i32
  }
  func.func @transform_9(%arg0: i32) -> (i32, i32, i32) {
    %c0_i32 = arith.constant 0 : i32
    %c0_i32_0 = arith.constant 0 : i32
    %c0_i32_1 = arith.constant 0 : i32
    %c0_i32_2 = arith.constant 0 : i32
    return %c0_i32, %c0_i32_0, %c0_i32_1 : i32, i32, i32
  }
  func.func @transform_10(%arg0: i32) -> (i32, i32, i32) {
    %c0_i32 = arith.constant 0 : i32
    %c0_i32_0 = arith.constant 0 : i32
    %c0_i32_1 = arith.constant 0 : i32
    %c0_i32_2 = arith.constant 0 : i32
    return %c0_i32, %c0_i32_0, %c0_i32_1 : i32, i32, i32
  }
  func.func @transform_11(%arg0: i32) -> (i32, i32, i32) {
    %c0_i32 = arith.constant 0 : i32
    %c0_i32_0 = arith.constant 0 : i32
    %c0_i32_1 = arith.constant 0 : i32
    %c0_i32_2 = arith.constant 0 : i32
    return %c0_i32, %c0_i32_0, %c0_i32_1 : i32, i32, i32
  }
  func.func @transform_12(%arg0: i32) -> (i32, i32) {
    %c0_i32 = arith.constant 0 : i32
    %c0_i32_0 = arith.constant 0 : i32
    return %c0_i32, %arg0 : i32, i32
  }
  func.func @transform_13(%arg0: i32) -> (i32, i32) {
    %c0_i32 = arith.constant 0 : i32
    %c0_i32_0 = arith.constant 0 : i32
    return %c0_i32, %arg0 : i32, i32
  }
  func.func @transform_14(%arg0: i32) -> (i32, i32) {
    %c0_i32 = arith.constant 0 : i32
    %c0_i32_0 = arith.constant 0 : i32
    return %c0_i32, %arg0 : i32, i32
  }
}

</mosaic_0001>

<bundles_post_ra>
// kernel: tpu_custom_call.1
= control target key start
LH: loop header
LB: loop body
LE: loop exit
PB: predicated region body
PF: predicated region fallthrough
CT: control target
= control target key end

     0   :  { %s3586_s0 = inlined_call_operand.vmem [shape: f32[8,24], index: 0, kind: input, shape index: {}]   ;;  %s3587_s1 = inlined_call_operand.vmem [shape: f32[1,16], index: 1, kind: input, shape index: {}]   ;;  %s3588_s2 = inlined_call_operand.vmem [shape: f32[16,256], index: 2, kind: input, shape index: {}]   ;;  %s3589_s3 = inlined_call_operand.vmem [shape: f32[1,256], index: 3, kind: input, shape index: {}]   ;;  %s3590_s4 = inlined_call_operand.vmem [shape: f32[24,32], index: 4, kind: input, shape index: {}]   ;;  %s3591_s5 = inlined_call_operand.vmem [shape: f32[1,32], index: 5, kind: input, shape index: {}]   ;;  %s3592_s6 = inlined_call_operand.vmem [shape: f32[2,32,32], index: 6, kind: input, shape index: {}]   ;;  %s3593_s7 = inlined_call_operand.vmem [shape: f32[2,1,32], index: 7, kind: input, shape index: {}]   ;;  %s3594_s8 = inlined_call_operand.vmem [shape: f32[2,32,32], index: 8, kind: input, shape index: {}]   ;;  %s3595_s9 = inlined_call_operand.vmem [shape: f32[2,1,32], index: 9, kind: input, shape index: {}]   ;;  %s3596_s10 = inlined_call_operand.vmem [shape: f32[2,256,32], index: 10, kind: input, shape index: {}]   ;;  %s3597_s11 = inlined_call_operand.vmem [shape: f32[2,1,32], index: 11, kind: input, shape index: {}]   ;;  %s3598_s12 = inlined_call_operand.hbm [shape: bf16[32,10240], index: 12, kind: input, shape index: {}]   ;;  %s3599_s13 = inlined_call_operand.vmem [shape: f32[1,10240], index: 13, kind: input, shape index: {}]   ;;  %s3600_s14 = inlined_call_operand.hbm [shape: f32[8,10240], index: 14, kind: output, shape index: {}]  }
   0x1   :  { %3610 = sst [smem:[#allocation15_spill]] %s3597_s11 }
   0x2   :  { %3611 = sst [smem:[#allocation16_spill]] %s3600_s14 }
   0x3   :  { %19 = vsyncpa [#allocation4], 0 }
   0x4   :  { %21 = vsyncpa [#allocation4 + $0x1], 0 }
   0x5   :  { %22 = vsyncpa [#allocation5], 0 }
   0x6   :  { %24 = vsyncpa [#allocation5 + $0x1], 0  ;;  %s2857_s29 = smov 0   ;;  %s2859_s30 = smov 0  }
   0x7   :  { %s2861_s15 = smov 0   ;;  %s2863_s16 = smov 0  }
   0x8 LB: > { %3612 = sst [smem:[#allocation9_spill]] %s2765_s29  ;;  %s2878_s17 = sadd.s32 4294967295, %s2777_s16   ;;  %s2777_s16 = sphi %s2863_s16, %s3628_s16   ;;  %s2773_s15 = sphi %s2861_s15, %s3630_s15   ;;  %s2769_s30 = sphi %s2859_s30, %s3632_s30   ;;  %s2765_s29 = sphi %s2857_s29, %s3631_s29  }
   0x9   : > { %3613 = sst [smem:[#allocation10_spill]] %s2773_s15  ;;  %s2123_s18 = sadd.s32 4294967294, %s2777_s16  }
   0xa   : > { %s2882_s19 = sadd.s32 1, %s2777_s16   ;;  %s289_s20 = sadd.s32 1, %s2773_s15 }
   0xb   : > { %3614 = sst [smem:[#allocation11_spill]] %s2882_s19  ;;  %s286_s21 = ssub.s32 %s2777_s16, %s2882_s19 }
   0xc   : > { %p296_p0 = scmp.ne.s32.totalorder %s2773_s15, %s2769_s30  ;;  %p287_p1 = scmp.eq.s32.totalorder %s286_s21, 0 }
   0xd   : > { %p297_p2 = scmp.eq.s32.totalorder %s2777_s16, 0  ;;  %p302_p3 = scmp.ne.s32.totalorder %s2769_s30, %s2765_s29 }
   0xe   : > { %p303_p4 = scmp.eq.s32.totalorder %s2878_s17, 0  ;;  %p352_p7 = scmp.eq.s32.totalorder %s2878_s17, 1 }
   0xf   : > { %s2894_s22 = scalar_select %p287_p1, %s2773_s15, %s289_s20  }
  0x10   : > { %p298_p5 = por %p297_p2, %p296_p0  ;;  %p2896_p6 = por %p303_p4, %p302_p3 }
  0x11   : > { %3615 = sst [smem:[#allocation12_spill]] %s2894_s22  ;;  %p358_p8 = scmp.eq.s32.totalorder %s2123_s18, 1 }
  0x12   : > { %p2125_p9 = scmp.ge.s32.totalorder %s2777_s16, 2  ;;  %p2639_p10 = scmp.lt.s32.totalorder %s2777_s16, 2 }
  0x13   : > { %p2903_p11 = por %p352_p7, %p296_p0  ;;  %p2907_p12 = por %p358_p8, %p302_p3 }
  0x14   : > { %s414_s26 = sand.u32 1, %s2773_s15   ;;  %s2542_s27 = smul.u32 160, %s2777_s16 }
  0x15   : > { %s3617_s24 = scalar_select %p2903_p11, 1, 0 }
  0x16   : > { %s3619_s25 = scalar_select %p2907_p12, 1, 0 }
  0x17   : > { %3618 = sst [smem:[#allocation13_spill]] %s3617_s24  ;;  %s2624_s28 = smul.u32 640, %s414_s26 }
  0x18   : > { %3620 = sst [smem:[#allocation14_spill]] %s3619_s25  ;;  %s423_s22 = scalar_lea.hbm %s3598_s12, %s2542_s27 }
  0x19   : > { %p2916_p13 = pnand %p2639_p10, %p298_p5  ;;  %s424_s18 = sshll.u32 %s423_s22, 4  ;;  %s425_s18 = int_to_ptr.hbm [resolvable:$true] %s424_s18 }
  0x1a   : > { %s418_s29 = scalar_lea.vmem [#allocation3], %s2624_s28  ;;  %p2127_p0 = scmp.ge.s32.totalorder %s2777_s16, 1 }
  0x1b   : > { %s426_s24 = sshll.u32 %s418_s29, 4  ;;  %s415_s14 = scalar_lea.sflag [#allocation4], %s414_s26  ;;  %s427_s24 = int_to_ptr.vmem [resolvable:$true] %s426_s24 }
  0x1c   : > { %s2681_s25 = sshra.s32 %s425_s18, 4  ;;  %p2685_p2 = pneg %p2916_p13  ;;  %s2682_s25 = int_to_ptr.hbm [resolvable:$true] %s2681_s25 }
  0x1d   : > { %s2683_s15 = scalar_lea.hbm %s2682_s25, 640  ;;  %s2688_s21 = scalar_lea.hbm %s3598_s12, 1280 }
  0x1e   : > { %p2684_p1 = scmp.ne.s32.totalorder %s2682_s25, %s2683_s15  ;;  %p2689_p5 = scmp.lt.s32.totalorder %s2682_s25, %s3598_s12 }
  0x1f   : > { %p2690_p7 = scmp.lt.s32.totalorder %s2688_s21, %s2683_s15 }
  0x20   : > { %p2686_p3 = pnand %p2685_p2, %p2684_p1 }
  0x21   : > { %p2691_p8 = por %p2690_p7, %p2689_p5 }
  0x22   : > { %p2687_p4 = pneg %p2686_p3 }
  0x24   : > { %p2692_p10 = pnand %p2691_p8, %p2687_p4 }
  0x26   : > { %2695 = shalt.err (!%p2692_p10)
}
  0x27   : > { %s2779_s29 = smov 5120   ;;  %s2780_s26 = smov 2560  }
  0x28   : > { %s2781_s28 = smov 160   ;;  %p442_p1 = scmp.lt.s32.totalorder %s2777_s16, 3 }
  0x29   : > { %2634 = dma.hbm_to_vmem [thread:$0]  (!%p2916_p13), %s425_s18, 10240, %s427_s24, %s415_s14, %s2779_s29, %s2780_s26, %s2781_s28  }
  0x2a   : > { %p443_p2 = pnand %p2127_p0, %p442_p1 }
  0x2b   : > { %s2935_s11 = sand.u32 (!%p443_p2), 1, %s2769_s30  }
  0x2c   : > { %446 = sbr.rel (%p443_p2) target bundleno = 1053 (0x41d), region = 76  ;;  %s449_s25 = scalar_lea.sflag (!%p443_p2), [#allocation4], %s2935_s11 }
  0x2d   : > { %s2625_s15 = smul.u32 (!%p443_p2), 640, %s2935_s11 }
  0x2f   : > { %s2939_s27 = scalar_lea.vmem (!%p443_p2), [#allocation3], %s2625_s15 }
  0x31   : > { %2756 = dma.done.wait (%p2896_p6), %s449_s25, 10240  }
  0x32   : > { %2758 = vsyncadd (%p2896_p6), %s449_s25, 4294957056  ;;  %s2626_s14 = smul.u32 320, %s2935_s11  ;;  %p2128_p0 = scmp.ne.s32.totalorder %s2878_s17, 0 }
  0x33   : > { %s503_s19 = smul.u32 40, %s2878_s17  ;;  %s3622_s18 = sld [smem:[#allocation15_spill]] (!%p2128_p0) }
  0x34   : > { %s2952_s21 = scalar_lea.vmem [#allocation6], %s2626_s14  ;;  %513 = sbr.rel (%p2128_p0) target bundleno = 756 (0x2f4), region = 84 }
  0x35   : > { %p504_p13 = scmp.lt.s32.totalorder %s503_s19, 79 }
  0x37   : > { %s3634_s19 = smov (!%p504_p13, %s503_s19), 79 }
  0x38   : > { %s2950_s20 = scalar_lea.vmem %s3599_s13, %s3634_s19 }
  0x39   : > { %v572_v0 = vld [vmem:[%s3590_s4 + $0x10] sm:$0xff]  ;;  %v571_v1 = vld [vmem:[%s3590_s4 + $0x8] sm:$0xff]  ;;  %v570_v2 = vld [vmem:[%s3590_s4] sm:$0xff]  ;;  %vm577_vm0 = vcmask 195584   ;;  %vm525_vm1 = vcmask 130048   ;;  %vm610_vm2 = vcmask 261120  }
  0x3a   : > { %594 = vmatpush.msra.mxu2 %v572_v0  ;;  %v569_v3 = vld [vmem:[%s3586_s0] sm:$0xff]  ;;  %v605_v4 = vld [vmem:[%s3592_s6 + $0x18] sm:$0xff]  ;;  %v604_v5 = vld [vmem:[%s3592_s6 + $0x10] sm:$0xff]  ;;  %vm890_vm3 = vcmask 257024  }
  0x3b   : > { %v603_v6 = vld [vmem:[%s3592_s6 + $0x8] sm:$0xff]  ;;  %v602_v7 = vld [vmem:[%s3592_s6] sm:$0xff]  ;;  %v518_v8 = vld [vmem:[%s3588_s2 + $0x18] sm:$0xff] }
  0x3c   : > { %595 = vmatpush.msra.mxu2 %v571_v1  ;;  %v516_v9 = vld [vmem:[%s3588_s2 + $0x8] sm:$0xff]  ;;  %563 = vmatpush.msra.mxu1 %v518_v8  ;;  %v514_v10 = vld [vmem:[%s3587_s1] sm:$0x1]  ;;  %v517_v11 = vld [vmem:[%s3588_s2 + $0x10] sm:$0xff] }
  0x3d   : > { %v515_v12 = vld [vmem:[%s3588_s2] sm:$0xff]  ;;  %543 = vmatpush.msra.mxu0 %v517_v11  ;;  %v638_v13 = vld [vmem:[%s3594_s8 + $0x18] sm:$0xff]  ;;  %v697_v15 = vld [vmem:[%s3596_s10 + $0xf0] sm:$0xff] }
  0x3e   : > { %596 = vmatpush.msra.mxu2 %v570_v2  ;;  %v698_v14 = vld [vmem:[%s3596_s10 + $0xf8] sm:$0xff]  ;;  %564 = vmatpush.msra.mxu1 %v516_v9  ;;  %v637_v16 = vld [vmem:[%s3594_s8 + $0x10] sm:$0xff]  ;;  %v696_v17 = vld [vmem:[%s3596_s10 + $0xe8] sm:$0xff] }
  0x3f   : > { %2131 = vmatmul.msk.f32.vlgmr.msra.gmra.mxu2 %vm577_vm0, %v569_v3  ;;  %2130 = vmatmul.msk.f32.vlgmr.msra.gmra.mxu1 %vm525_vm1, %v514_v10  ;;  %v636_v18 = vld [vmem:[%s3594_s8 + $0x8] sm:$0xff]  ;;  %v695_v19 = vld [vmem:[%s3596_s10 + $0xe0] sm:$0xff]  ;;  %v682_v21 = vld [vmem:[%s3596_s10 + $0x78] sm:$0xff] }
  0x40   : > { %626 = vmatpush.msrb.mxu2 %v605_v4  ;;  %544 = vmatpush.msra.mxu0 %v515_v12  ;;  %v635_v20 = vld [vmem:[%s3594_s8] sm:$0xff]  ;;  %v694_v22 = vld [vmem:[%s3596_s10 + $0xd8] sm:$0xff]  ;;  %v681_v23 = vld [vmem:[%s3596_s10 + $0x70] sm:$0xff] }
  0x41   : > { %2129 = vmatmul.msk.f32.vlgmr.msra.gmra.mxu0 %vm525_vm1, %v514_v10  ;;  %658 = vmatpush.msrb.mxu1 %v638_v13  ;;  %v693_v24 = vld [vmem:[%s3596_s10 + $0xd0] sm:$0xff]  ;;  %v680_v25 = vld [vmem:[%s3596_s10 + $0x68] sm:$0xff]  ;;  %v679_v27 = vld [vmem:[%s3596_s10 + $0x60] sm:$0xff] }
  0x42   : > { %627 = vmatpush.msrb.mxu2 %v604_v5  ;;  %v692_v26 = vld [vmem:[%s3596_s10 + $0xc8] sm:$0xff]  ;;  %v691_v28 = vld [vmem:[%s3596_s10 + $0xc0] sm:$0xff]  ;;  %v678_v29 = vld [vmem:[%s3596_s10 + $0x58] sm:$0xff] }
  0x43   : > { %659 = vmatpush.msrb.mxu1 %v637_v16  ;;  %v690_v30 = vld [vmem:[%s3596_s10 + $0xb8] sm:$0xff]  ;;  %v677_v31 = vld [vmem:[%s3596_s10 + $0x50] sm:$0xff]  ;;  %v676_v33 = vld [vmem:[%s3596_s10 + $0x48] sm:$0xff] }
  0x44   : > { %628 = vmatpush.msrb.mxu2 %v603_v6  ;;  %v689_v32 = vld [vmem:[%s3596_s10 + $0xb0] sm:$0xff]  ;;  %v688_v34 = vld [vmem:[%s3596_s10 + $0xa8] sm:$0xff]  ;;  %v675_v35 = vld [vmem:[%s3596_s10 + $0x40] sm:$0xff] }
  0x45   : > { %660 = vmatpush.msrb.mxu1 %v636_v18  ;;  %v2676_v36 = vld [vmem:[%s3591_s5] ss:$0 sm:$0xff]  ;;  %v674_v37 = vld [vmem:[%s3596_s10 + $0x38] sm:$0xff]  ;;  %v673_v41 = vld [vmem:[%s3596_s10 + $0x30] sm:$0xff] }
  0x46   : > { %629 = vmatpush.msrb.mxu2 %v602_v7  ;;  %v687_v42 = vld [vmem:[%s3596_s10 + $0xa0] sm:$0xff]  ;;  %v672_v43 = vld [vmem:[%s3596_s10 + $0x28] sm:$0xff]  ;;  %v686_v44 = vld [vmem:[%s3596_s10 + $0x98] sm:$0xff] }
  0x47   : > { %661 = vmatpush.msrb.mxu1 %v635_v20  ;;  %v671_v45 = vld [vmem:[%s3596_s10 + $0x20] sm:$0xff]  ;;  %v685_v46 = vld [vmem:[%s3596_s10 + $0x90] sm:$0xff]  ;;  %v670_v50 = vld [vmem:[%s3596_s10 + $0x18] sm:$0xff] }
  0x48   : > { %720 = vmatpush.msra.mxu2 %v698_v14  ;;  %v519_v47 = vld [vmem:[%s3589_s3] sm:$0x3]  ;;  %v684_v51 = vld [vmem:[%s3596_s10 + $0x88] sm:$0xff]  ;;  %v669_v52 = vld [vmem:[%s3596_s10 + $0x10] sm:$0xff] }
  0x49   : > { %700 = vmatpush.msra.mxu1 %v682_v21  ;;  %v522_v48 = vperm.slane %v519_v47, 1  ;;  %v683_v53 = vld [vmem:[%s3596_s10 + $0x80] sm:$0xff]  ;;  %v668_v55 = vld [vmem:[%s3596_s10 + $0x8] sm:$0xff]  ;;  %v2137_v57 = vld [vmem:[%s3592_s6 + $0x38] sm:$0xff]  ;;  %v521_v4 = vperm.slane %v519_v47, 0 }
  0x4a   : > { %721 = vmatpush.msra.mxu2 %v697_v15  ;;  %v667_v56 = vld [vmem:[%s3596_s10] sm:$0xff]  ;;  %v2136_v58 = vld [vmem:[%s3592_s6 + $0x30] sm:$0xff]  ;;  %768 = vmatpush.msra.mxu3 %v2137_v57  ;;  %v2135_v59 = vld [vmem:[%s3592_s6 + $0x28] sm:$0xff] }
  0x4b   : > { %701 = vmatpush.msra.mxu1 %v681_v23  ;;  %v2134_v60 = vld [vmem:[%s3592_s6 + $0x20] sm:$0xff]  ;;  %v2161_v61 = vld [vmem:[%s3596_s10 + $0x178] sm:$0xff]  ;;  %v2160_v62 = vld [vmem:[%s3596_s10 + $0x170] sm:$0xff] }
  0x4c   : > { %722 = vmatpush.msra.mxu2 %v696_v17  ;;  %769 = vmatpush.msra.mxu3 %v2136_v58  ;;  %v2159_v63 = vld [vmem:[%s3596_s10 + $0x168] sm:$0xff]  ;;  %v2677_v0 = vld [vmem:[%s3593_s7] ss:$0 sm:$0xff]  ;;  %v2157_v8 = vld [vmem:[%s3596_s10 + $0x158] sm:$0xff] }
  0x4d   : > { %702 = vmatpush.msra.mxu1 %v680_v25  ;;  %v2158_v7 = vld [vmem:[%s3596_s10 + $0x160] sm:$0xff]  ;;  %v2156_v9 = vld [vmem:[%s3596_s10 + $0x150] sm:$0xff]  ;;  %v2155_v10 = vld [vmem:[%s3596_s10 + $0x148] sm:$0xff] }
  0x4e   : > { %723 = vmatpush.msra.mxu2 %v695_v19  ;;  %770 = vmatpush.msra.mxu3 %v2135_v59  ;;  %v2154_v11 = vld [vmem:[%s3596_s10 + $0x140] sm:$0xff]  ;;  %v2153_v12 = vld [vmem:[%s3596_s10 + $0x138] sm:$0xff]  ;;  %v2152_v13 = vld [vmem:[%s3596_s10 + $0x130] sm:$0xff] }
  0x4f   : > { %703 = vmatpush.msra.mxu1 %v679_v27  ;;  %v2151_v14 = vld [vmem:[%s3596_s10 + $0x128] sm:$0xff]  ;;  %v2150_v15 = vld [vmem:[%s3596_s10 + $0x120] sm:$0xff]  ;;  %v2149_v16 = vld [vmem:[%s3596_s10 + $0x118] sm:$0xff] }
  0x50   : > { %724 = vmatpush.msra.mxu2 %v694_v22  ;;  %771 = vmatpush.msra.mxu3 %v2134_v60  ;;  %v2148_v17 = vld [vmem:[%s3596_s10 + $0x110] sm:$0xff]  ;;  %v2147_v18 = vld [vmem:[%s3596_s10 + $0x108] sm:$0xff]  ;;  %v2146_v19 = vld [vmem:[%s3596_s10 + $0x100] sm:$0xff] }
  0x51   : > { %704 = vmatpush.msra.mxu1 %v678_v29  ;;  %v2143_v20 = vld [vmem:[%s3594_s8 + $0x38] sm:$0xff]  ;;  %v2142_v21 = vld [vmem:[%s3594_s8 + $0x30] sm:$0xff]  ;;  %v2141_v22 = vld [vmem:[%s3594_s8 + $0x28] sm:$0xff] }
  0x52   : > { %725 = vmatpush.msra.mxu2 %v693_v24  ;;  %846 = vmatpush.msrb.mxu3 %v2161_v61  ;;  %v2140_v23 = vld [vmem:[%s3594_s8 + $0x20] sm:$0xff]  ;;  %v2177_v24 = vld [vmem:[%s3596_s10 + $0x1f8] sm:$0xff]  ;;  %v2168_v47 = vld [vmem:[%s3596_s10 + $0x1b0] sm:$0xff] }
  0x53   : > { %705 = vmatpush.msra.mxu1 %v677_v31  ;;  %802 = vmatpush.msrb.mxu0 %v2143_v20  ;;  %v2678_v27 = vld [vmem:[%s3595_s9] ss:$0 sm:$0xff]  ;;  %v2680_v57 = vld [vmem:[%s3595_s9 + $0x1] ss:$0 sm:$0xff] }
  0x54   : > { %726 = vmatpush.msra.mxu2 %v692_v26  ;;  %847 = vmatpush.msrb.mxu3 %v2160_v62  ;;  %v2176_v26 = vld [vmem:[%s3596_s10 + $0x1f0] sm:$0xff]  ;;  %v2174_v29 = vld [vmem:[%s3596_s10 + $0x1e0] sm:$0xff] }
  0x55   : > { %706 = vmatpush.msra.mxu1 %v676_v33  ;;  %803 = vmatpush.msrb.mxu0 %v2142_v21  ;;  %v699_v31 = vld [vmem:[%s3622_s18] sm:$0x1]  ;;  %v2178_v60 = vld [vmem:[%s3622_s18 + $0x1] sm:$0x1] }
  0x56   : > { %727 = vmatpush.msra.mxu2 %v691_v28  ;;  %848 = vmatpush.msrb.mxu3 %v2159_v63  ;;  %v2175_v28 = vld [vmem:[%s3596_s10 + $0x1e8] sm:$0xff] }
  0x57   : > { %707 = vmatpush.msra.mxu1 %v675_v35  ;;  %804 = vmatpush.msrb.mxu0 %v2141_v22  ;;  %v2172_v35 = vld [vmem:[%s3596_s10 + $0x1d0] sm:$0xff] }
  0x58   : > { %728 = vmatpush.msra.mxu2 %v690_v30  ;;  %849 = vmatpush.msrb.mxu3 %v2158_v7 }
  0x59   : > { %708 = vmatpush.msra.mxu1 %v674_v37  ;;  %805 = vmatpush.msrb.mxu0 %v2140_v23 }
  0x5a   : > { %729 = vmatpush.msra.mxu2 %v689_v32  ;;  %850 = vmatpush.msrb.mxu3 %v2157_v8  ;;  %v2173_v32 = vld [vmem:[%s3596_s10 + $0x1d8] sm:$0xff] }
  0x5b   : > { %709 = vmatpush.msra.mxu1 %v673_v41  ;;  %866 = vmatpush.msra.mxu0 %v2177_v24 }
  0x5c   : > { %730 = vmatpush.msra.mxu2 %v688_v34  ;;  %851 = vmatpush.msrb.mxu3 %v2156_v9 }
  0x5d   : > { %710 = vmatpush.msra.mxu1 %v672_v43  ;;  %867 = vmatpush.msra.mxu0 %v2176_v26 }
  0x5e   : > { %731 = vmatpush.msra.mxu2 %v687_v42  ;;  %852 = vmatpush.msrb.mxu3 %v2155_v10  ;;  %v2170_v42 = vld [vmem:[%s3596_s10 + $0x1c0] sm:$0xff] }
  0x5f   : > { %711 = vmatpush.msra.mxu1 %v671_v45  ;;  %868 = vmatpush.msra.mxu0 %v2175_v28  ;;  %v2169_v45 = vld [vmem:[%s3596_s10 + $0x1b8] sm:$0xff] }
  0x60   : > { %732 = vmatpush.msra.mxu2 %v686_v44  ;;  %853 = vmatpush.msrb.mxu3 %v2154_v11 }
  0x61   : > { %712 = vmatpush.msra.mxu1 %v670_v50  ;;  %869 = vmatpush.msra.mxu0 %v2174_v29  ;;  %v2163_v50 = vld [vmem:[%s3596_s10 + $0x188] sm:$0xff] }
  0x62   : > { %733 = vmatpush.msra.mxu2 %v685_v46  ;;  %854 = vmatpush.msrb.mxu3 %v2153_v12 }
  0x63   : > { %713 = vmatpush.msra.mxu1 %v669_v52  ;;  %870 = vmatpush.msra.mxu0 %v2173_v32  ;;  %v2679_v52 = vld [vmem:[%s3593_s7 + $0x1] ss:$0 sm:$0xff] }
  0x64   : > { %734 = vmatpush.msra.mxu2 %v684_v51  ;;  %855 = vmatpush.msrb.mxu3 %v2152_v13  ;;  %v2162_v51 = vld [vmem:[%s3596_s10 + $0x180] sm:$0xff] }
  0x65   : > { %714 = vmatpush.msra.mxu1 %v668_v55  ;;  %871 = vmatpush.msra.mxu0 %v2172_v35 }
  0x66   : > { %735 = vmatpush.msra.mxu2 %v683_v53  ;;  %856 = vmatpush.msrb.mxu3 %v2151_v14 }
  0x67   : > { %715 = vmatpush.msra.mxu1 %v667_v56 }
  0x68   : > { %857 = vmatpush.msrb.mxu3 %v2150_v15 }
  0x6a   : > { %858 = vmatpush.msrb.mxu3 %v2149_v16 }
  0x6c   : > { %859 = vmatpush.msrb.mxu3 %v2148_v17 }
  0x6e   : > { %860 = vmatpush.msrb.mxu3 %v2147_v18 }
  0x70   : > { %861 = vmatpush.msrb.mxu3 %v2146_v19 }
  0xbc   : > { %v566_v49 = vpop.f32.mrf.mxu1 }
  0xbd   : > { %v3108_v54 = vadd.f32 %v566_v49, %v522_v48  ;;  %v2165_v48 = vld [vmem:[%s3596_s10 + $0x198] sm:$0xff]  ;;  %v2164_v49 = vld [vmem:[%s3596_s10 + $0x190] sm:$0xff] }
  0xbe   : > { %v546_v5 = vpop.f32.mrf.mxu0 }
  0xbf   : > { %v3142_v6 = vadd.f32 %v546_v5, %v521_v4 }
  0xc2   : > { %v598_v38 = vpop.f32.mrf.mxu2 }
  0xc3   : > { %v3069_v39 = vadd.f32 %v2676_v36, %v598_v38  ;;  %v2171_v38 = vld [vmem:[%s3596_s10 + $0x1c8] sm:$0xff] }
  0xc4   : > { %872 = vmatpush.msra.mxu0 %v2171_v38 }
  0xc5   : > { %v601_v40 = vmax.f32 %v3069_v39, 0.0  ;;  %v2167_v39 = vld [vmem:[%s3596_s10 + $0x1a8] sm:$0xff] }
  0xc6   : > { %873 = vmatpush.msra.mxu0 %v2170_v42 }
  0xc7   : > { %2132 = vmatmul.msk.f32.vlgmr.msrb.gmra.mxu2 %vm610_vm2, %v601_v40 }
  0xc8   : > { %874 = vmatpush.msra.mxu0 %v2169_v45 }
  0xca   : > { %875 = vmatpush.msra.mxu0 %v2168_v47 }
  0xcc   : > { %876 = vmatpush.msra.mxu0 %v2167_v39 }
  0xcf   : > { %736 = vmatmul.f32.vlgmr.msra.gmra.mxu2 %v3108_v54 }
 0x14a   : > { %v631_v1 = vpop.f32.mrf.mxu2 }
 0x14b   : > { %v632_v2 = vadd.f32 %v2677_v0, %v631_v1 }
 0x14d   : > { %v634_v3 = vmax.f32 %v632_v2, 0.0 }
 0x14f   : > { %2133 = vmatmul.msk.f32.vlgmr.msrb.gmra.mxu1 %vm610_vm2, %v634_v3 }
 0x152   : > { %v737_v34 = vpop.f32.mrf.mxu2 }
 0x157   : > { %716 = vmatmul.f32.vlgmr.msra.gmra.mxu1 %v3142_v6 }
 0x1cc   : > { %v663_v25 = vpop.f32.mrf.mxu1 }
 0x1cd   : > { %v664_v30 = vadd.f32 %v2678_v27, %v663_v25 }
 0x1cf   : > { %v666_v36 = vmax.f32 %v664_v30, 0.0 }
 0x1d1   : > { %v740_v43 = vadd.f32 %v666_v36, %v601_v40  ;;  %v2166_v40 = vld [vmem:[%s3596_s10 + $0x1a0] sm:$0xff] }
 0x1d2   : > { %877 = vmatpush.msra.mxu0 %v2166_v40 }
 0x1d4   : > { %v717_v33 = vpop.f32.mrf.mxu1  ;;  %878 = vmatpush.msra.mxu0 %v2165_v48 }
 0x1d5   : > { %v718_v37 = vadd.f32 %v717_v33, %v699_v31 }
 0x1d6   : > { %879 = vmatpush.msra.mxu0 %v2164_v49 }
 0x1d7   : > { %v738_v41 = vadd.f32 %v737_v34, %v718_v37 }
 0x1d8   : > { %880 = vmatpush.msra.mxu0 %v2163_v50 }
 0x1d9   : > { %v741_v44 = vperm.slane %v738_v41, 0 }
 0x1da   : > { %881 = vmatpush.msra.mxu0 %v2162_v51 }
 0x1db   : > { %v742_v46 = vadd.f32 %v741_v44, %v740_v43 }
 0x1dd   : > { %2139 = vmatmul.msk.f32.vlgmr.msra.gmra.mxu3 %vm610_vm2, %v742_v46 }
 0x1e5   : > { %862 = vmatmul.f32.vlgmr.msrb.gmra.mxu3 %v3142_v6 }
 0x260   : > { %v773_v53 = vpop.f32.mrf.mxu3 }
 0x261   : > { %v774_v55 = vadd.f32 %v2679_v52, %v773_v53 }
 0x263   : > { %v776_v56 = vmax.f32 %v774_v55, 0.0 }
 0x265   : > { %2145 = vmatmul.msk.f32.vlgmr.msrb.gmra.mxu0 %vm610_vm2, %v776_v56 }
 0x268   : > { %v863_v61 = vpop.f32.mrf.mxu3 }
 0x269   : > { %v864_v62 = vadd.f32 %v2178_v60, %v863_v61 }
 0x26d   : > { %882 = vmatmul.f32.vlgmr.msra.gmra.mxu0 %v3108_v54 }
 0x2e2   : > { %v807_v58 = vpop.f32.mrf.mxu0 }
 0x2e3   : > { %v808_v59 = vadd.f32 %v2680_v57, %v807_v58 }
 0x2e5   : > { %v810_v63 = vmax.f32 %v808_v59, 0.0 }
 0x2e7   : > { %v886_v2 = vadd.f32 %v810_v63, %v742_v46 }
 0x2ea   : > { %v883_v0 = vpop.f32.mrf.mxu0 }
 0x2eb   : > { %v884_v1 = vadd.f32 %v883_v0, %v864_v62 }
 0x2ed   : > { %v887_v3 = vperm.slane %v884_v1, 0 }
 0x2ef   : > { %v888_v4 = vadd.f32 %v887_v3, %v886_v2 }
 0x2f1   : > { %v889_v54 = vpack.c.bf16 %v888_v4, %v888_v4 }
 0x2f3   : > { %891 = vst.msk [vmem:[#allocation2] sm:$0xf] %vm890_vm3, %v889_v54 }
 0x2f4 PF: > { %v2341_v5 = vld [vmem:[%s2939_s27 + $0x140] sm:$0xf]  ;;  %v2583_v7 = vld [vmem:[%s2939_s27 + $0x144] sm:$0xf]  ;;  %v2349_v10 = vld [vmem:[%s2939_s27 + $0x148] sm:$0xf] }
 0x2f5   : > { %v2603_v6 = vld [vmem:[%s2939_s27 + $0x1dc] sm:$0xf0]  ;;  %v2343_v9 = vld [vmem:[%s2939_s27 + $0x1e0] sm:$0xf0]  ;;  %v2604_v11 = vld [vmem:[%s2939_s27 + $0x1e4] sm:$0xf0] }
 0x2f6   : > { %v2342_v8 = vor.u32 %v2603_v6, %v2341_v5  ;;  %v2346_v12 = vor.u32 %v2583_v7, %v2343_v9  ;;  %v2350_v13 = vor.u32 %v2604_v11, %v2349_v10  ;;  %v2584_v14 = vld [vmem:[%s2939_s27 + $0x14c] sm:$0xf]  ;;  %v2181_v16 = vld [vmem:[%s2939_s27] sm:$0xf]  ;;  %v2543_v19 = vld [vmem:[%s2939_s27 + $0x4] sm:$0xf] }
 0x2f7   : > { %v2351_v15 = vld [vmem:[%s2939_s27 + $0x1e8] sm:$0xf0]  ;;  %v2563_v18 = vld [vmem:[%s2939_s27 + $0x9c] sm:$0xf0]  ;;  %v2183_v20 = vld [vmem:[%s2939_s27 + $0xa0] sm:$0xf0] }
 0x2f8   : > { %1473 = vmatpush.bf16.msra.mxu0 %v2342_v8  ;;  %v2354_v17 = vor.u32 %v2584_v14, %v2351_v15  ;;  %1486 = vmatpush.bf16.msra.mxu1 %v2346_v12  ;;  %v2182_v21 = vor.u32 %v2563_v18, %v2181_v16  ;;  %v2186_v22 = vor.u32 %v2543_v19, %v2183_v20  ;;  %v2189_v23 = vld [vmem:[%s2939_s27 + $0x8] sm:$0xf]  ;;  %v2544_v25 = vld [vmem:[%s2939_s27 + $0xc] sm:$0xf]  ;;  %vm1463_vm4 = vcmask 261120   ;;  %s3623_s29 = sld [smem:[#allocation16_spill]] }
 0x2f9   : > { %1499 = vmatpush.bf16.msra.mxu2 %v2350_v13  ;;  %v2564_v24 = vld [vmem:[%s2939_s27 + $0xa4] sm:$0xf0]  ;;  %v2191_v27 = vld [vmem:[%s2939_s27 + $0xa8] sm:$0xf0]  ;;  %v2365_v30 = vld [vmem:[%s2939_s27 + $0x158] sm:$0xf] }
 0x2fa   : > { %1512 = vmatpush.bf16.msra.mxu3 %v2354_v17  ;;  %v2190_v26 = vor.u32 %v2564_v24, %v2189_v23  ;;  %v3281_v28 = vld [vmem:[#allocation2] sm:$0xf]  ;;  %v2194_v29 = vor.u32 %v2544_v25, %v2191_v27  ;;  %v2606_v31 = vld [vmem:[%s2939_s27 + $0x1f4] sm:$0xf0]  ;;  %v2357_v35 = vld [vmem:[%s2939_s27 + $0x150] sm:$0xf] }
 0x2fb   : > { %v2586_v32 = vld [vmem:[%s2939_s27 + $0x15c] sm:$0xf]  ;;  %v2366_v33 = vor.u32 %v2606_v31, %v2365_v30  ;;  %v2605_v36 = vld [vmem:[%s2939_s27 + $0x1ec] sm:$0xf0]  ;;  %v2585_v41 = vld [vmem:[%s2939_s27 + $0x154] sm:$0xf] }
 0x2fc   : > { %1474 = vmatpush.bf16.msra.mxu0 %v2182_v21  ;;  %v2367_v34 = vld [vmem:[%s2939_s27 + $0x1f8] sm:$0xf0]  ;;  %1487 = vmatpush.bf16.msra.mxu1 %v2186_v22  ;;  %v2358_v38 = vor.u32 %v2605_v36, %v2357_v35  ;;  %v2359_v42 = vld [vmem:[%s2939_s27 + $0x1f0] sm:$0xf0]  ;;  %v2205_v43 = vld [vmem:[%s2939_s27 + $0x18] sm:$0xf] }
 0x2fd   : > { %1500 = vmatpush.bf16.msra.mxu2 %v2190_v26  ;;  %v2370_v37 = vor.u32 %v2586_v32, %v2367_v34  ;;  %v2362_v44 = vor.u32 %v2585_v41, %v2359_v42  ;;  %v2566_v45 = vld [vmem:[%s2939_s27 + $0xb4] sm:$0xf0]  ;;  %v2546_v46 = vld [vmem:[%s2939_s27 + $0x1c] sm:$0xf]  ;;  %v2197_v48 = vld [vmem:[%s2939_s27 + $0x10] sm:$0xf] }
 0x2fe   : > { %1513 = vmatpush.bf16.msra.mxu3 %v2194_v29  ;;  %v2207_v47 = vld [vmem:[%s2939_s27 + $0xb8] sm:$0xf0]  ;;  %v2206_v39 = vor.u32 %v2566_v45, %v2205_v43  ;;  %v2565_v49 = vld [vmem:[%s2939_s27 + $0xac] sm:$0xf0]  ;;  %v2545_v50 = vld [vmem:[%s2939_s27 + $0x14] sm:$0xf]  ;;  %s3624_s23 = smov %s3623_s29 }
 0x2ff   : > { %2499 = vmatmul.msk.bf16.vlgmr.msra.gmra.mxu0 %vm1463_vm4, %v3281_v28  ;;  %v2210_v40 = vor.u32 %v2546_v46, %v2207_v47  ;;  %2500 = vmatmul.msk.bf16.vlgmr.msra.gmra.mxu1 %vm1463_vm4, %v3281_v28  ;;  %v2199_v51 = vld [vmem:[%s2939_s27 + $0xb0] sm:$0xf0]  ;;  %v2381_v52 = vld [vmem:[%s2939_s27 + $0x168] sm:$0xf]  ;;  %v2198_v55 = vor.u32 %v2565_v49, %v2197_v48  ;;  %v2588_v57 = vld [vmem:[%s2939_s27 + $0x16c] sm:$0xf] }
 0x300   : > { %2501 = vmatmul.msk.bf16.vlgmr.msra.gmra.mxu2 %vm1463_vm4, %v3281_v28  ;;  %v2608_v53 = vld [vmem:[%s2939_s27 + $0x204] sm:$0xf0]  ;;  %1525 = vmatpush.bf16.msrb.mxu0 %v2358_v38  ;;  %v2383_v58 = vld [vmem:[%s2939_s27 + $0x208] sm:$0xf0]  ;;  %v2373_v59 = vld [vmem:[%s2939_s27 + $0x160] sm:$0xf]  ;;  %v2202_v60 = vor.u32 %v2545_v50, %v2199_v51 }
 0x301   : > { %1551 = vmatpush.bf16.msrb.mxu2 %v2366_v33  ;;  %2502 = vmatmul.msk.bf16.vlgmr.msra.gmra.mxu3 %vm1463_vm4, %v3281_v28  ;;  %v2382_v56 = vor.u32 %v2608_v53, %v2381_v52  ;;  %v2386_v61 = vor.u32 %v2588_v57, %v2383_v58  ;;  %v2607_v62 = vld [vmem:[%s2939_s27 + $0x1fc] sm:$0xf0]  ;;  %v2587_v63 = vld [vmem:[%s2939_s27 + $0x164] sm:$0xf]  ;;  %v2221_v3 = vld [vmem:[%s2939_s27 + $0x28] sm:$0xf] }
 0x302   : > { %1564 = vmatpush.bf16.msrb.mxu3 %v2370_v37  ;;  %1538 = vmatpush.bf16.msrb.mxu1 %v2362_v44  ;;  %v2375_v0 = vld [vmem:[%s2939_s27 + $0x200] sm:$0xf0]  ;;  %v2374_v1 = vor.u32 %v2607_v62, %v2373_v59  ;;  %v2568_v4 = vld [vmem:[%s2939_s27 + $0xc4] sm:$0xf0]  ;;  %v2548_v54 = vld [vmem:[%s2939_s27 + $0x2c] sm:$0xf] }
 0x303   : > { %v2378_v2 = vor.u32 %v2587_v63, %v2375_v0  ;;  %v2222_v5 = vor.u32 %v2568_v4, %v2221_v3  ;;  %v2223_v6 = vld [vmem:[%s2939_s27 + $0xc8] sm:$0xf0]  ;;  %v2213_v7 = vld [vmem:[%s2939_s27 + $0x20] sm:$0xf]  ;;  %v2547_v10 = vld [vmem:[%s2939_s27 + $0x24] sm:$0xf] }
 0x304   : > { %v2567_v8 = vld [vmem:[%s2939_s27 + $0xbc] sm:$0xf0]  ;;  %1526 = vmatpush.bf16.msrb.mxu0 %v2198_v55  ;;  %v2226_v9 = vor.u32 %v2548_v54, %v2223_v6  ;;  %v2215_v11 = vld [vmem:[%s2939_s27 + $0xc0] sm:$0xf0]  ;;  %v2397_v14 = vld [vmem:[%s2939_s27 + $0x178] sm:$0xf] }
 0x305   : > { %1552 = vmatpush.bf16.msrb.mxu2 %v2206_v39  ;;  %v2214_v12 = vor.u32 %v2567_v8, %v2213_v7  ;;  %v2218_v13 = vor.u32 %v2547_v10, %v2215_v11  ;;  %v2610_v15 = vld [vmem:[%s2939_s27 + $0x214] sm:$0xf0]  ;;  %v2590_v16 = vld [vmem:[%s2939_s27 + $0x17c] sm:$0xf]  ;;  %v2389_v18 = vld [vmem:[%s2939_s27 + $0x170] sm:$0xf] }
 0x306   : > { %1565 = vmatpush.bf16.msrb.mxu3 %v2210_v40  ;;  %1539 = vmatpush.bf16.msrb.mxu1 %v2202_v60  ;;  %v2399_v17 = vld [vmem:[%s2939_s27 + $0x218] sm:$0xf0]  ;;  %v2609_v19 = vld [vmem:[%s2939_s27 + $0x20c] sm:$0xf0]  ;;  %v2589_v20 = vld [vmem:[%s2939_s27 + $0x174] sm:$0xf]  ;;  %v2398_v22 = vor.u32 %v2610_v15, %v2397_v14 }
 0x307   : > { %v2391_v21 = vld [vmem:[%s2939_s27 + $0x210] sm:$0xf0]  ;;  %v2402_v23 = vor.u32 %v2590_v16, %v2399_v17  ;;  %v2390_v24 = vor.u32 %v2609_v19, %v2389_v18  ;;  %v2237_v25 = vld [vmem:[%s2939_s27 + $0x38] sm:$0xf]  ;;  %v2550_v27 = vld [vmem:[%s2939_s27 + $0x3c] sm:$0xf] }
 0x308   : > { %1577 = vmatpush.bf16.msra.mxu0 %v2374_v1  ;;  %v2570_v26 = vld [vmem:[%s2939_s27 + $0xd4] sm:$0xf0]  ;;  %v2394_v29 = vor.u32 %v2589_v20, %v2391_v21  ;;  %v2239_v30 = vld [vmem:[%s2939_s27 + $0xd8] sm:$0xf0]  ;;  %v2229_v31 = vld [vmem:[%s2939_s27 + $0x30] sm:$0xf] }
 0x309   : > { %1603 = vmatpush.bf16.msra.mxu2 %v2382_v56  ;;  %v2569_v32 = vld [vmem:[%s2939_s27 + $0xcc] sm:$0xf0]  ;;  %v2549_v33 = vld [vmem:[%s2939_s27 + $0x34] sm:$0xf]  ;;  %v2238_v35 = vor.u32 %v2570_v26, %v2237_v25  ;;  %v2242_v36 = vor.u32 %v2550_v27, %v2239_v30  ;;  %v2413_v41 = vld [vmem:[%s2939_s27 + $0x188] sm:$0xf] }
 0x30a   : > { %1616 = vmatpush.bf16.msra.mxu3 %v2386_v61  ;;  %1590 = vmatpush.bf16.msra.mxu1 %v2378_v2  ;;  %v2231_v34 = vld [vmem:[%s2939_s27 + $0xd0] sm:$0xf0]  ;;  %v2230_v37 = vor.u32 %v2569_v32, %v2229_v31  ;;  %v2612_v42 = vld [vmem:[%s2939_s27 + $0x224] sm:$0xf0]  ;;  %v2592_v43 = vld [vmem:[%s2939_s27 + $0x18c] sm:$0xf] }
 0x30b   : > { %v2234_v38 = vor.u32 %v2549_v33, %v2231_v34  ;;  %v2415_v44 = vld [vmem:[%s2939_s27 + $0x228] sm:$0xf0]  ;;  %v2405_v45 = vld [vmem:[%s2939_s27 + $0x180] sm:$0xf]  ;;  %v2591_v47 = vld [vmem:[%s2939_s27 + $0x184] sm:$0xf]  ;;  %v2414_v40 = vor.u32 %v2612_v42, %v2413_v41 }
 0x30c   : > { %1578 = vmatpush.bf16.msra.mxu0 %v2214_v12  ;;  %v2611_v46 = vld [vmem:[%s2939_s27 + $0x21c] sm:$0xf0]  ;;  %v2407_v39 = vld [vmem:[%s2939_s27 + $0x220] sm:$0xf0]  ;;  %v2418_v48 = vor.u32 %v2592_v43, %v2415_v44  ;;  %v2253_v50 = vld [vmem:[%s2939_s27 + $0x48] sm:$0xf] }
 0x30d   : > { %1604 = vmatpush.bf16.msra.mxu2 %v2222_v5  ;;  %v2406_v49 = vor.u32 %v2611_v46, %v2405_v45  ;;  %v2572_v51 = vld [vmem:[%s2939_s27 + $0xe4] sm:$0xf0]  ;;  %v2552_v52 = vld [vmem:[%s2939_s27 + $0x4c] sm:$0xf]  ;;  %v2410_v53 = vor.u32 %v2591_v47, %v2407_v39  ;;  %v2245_v56 = vld [vmem:[%s2939_s27 + $0x40] sm:$0xf] }
 0x30e   : > { %1617 = vmatpush.bf16.msra.mxu3 %v2226_v9  ;;  %1591 = vmatpush.bf16.msra.mxu1 %v2218_v13  ;;  %v2255_v55 = vld [vmem:[%s2939_s27 + $0xe8] sm:$0xf0]  ;;  %v2571_v57 = vld [vmem:[%s2939_s27 + $0xdc] sm:$0xf0]  ;;  %v2551_v58 = vld [vmem:[%s2939_s27 + $0x44] sm:$0xf]  ;;  %v2254_v60 = vor.u32 %v2572_v51, %v2253_v50 }
 0x30f   : > { %2503 = vmatmul.msk.bf16.vlgmr.msrb.gmra.mxu0 %vm1463_vm4, %v3281_v28  ;;  %2504 = vmatmul.msk.bf16.vlgmr.msrb.gmra.mxu1 %vm1463_vm4, %v3281_v28  ;;  %v2247_v59 = vld [vmem:[%s2939_s27 + $0xe0] sm:$0xf0]  ;;  %v2258_v61 = vor.u32 %v2552_v52, %v2255_v55  ;;  %v2246_v62 = vor.u32 %v2571_v57, %v2245_v56  ;;  %v2429_v0 = vld [vmem:[%s2939_s27 + $0x198] sm:$0xf]  ;;  %v2594_v2 = vld [vmem:[%s2939_s27 + $0x19c] sm:$0xf] }
 0x310   : > { %2505 = vmatmul.msk.bf16.vlgmr.msrb.gmra.mxu2 %vm1463_vm4, %v3281_v28  ;;  %1629 = vmatpush.bf16.msrb.mxu0 %v2390_v24  ;;  %v2250_v63 = vor.u32 %v2551_v58, %v2247_v59  ;;  %v2614_v1 = vld [vmem:[%s2939_s27 + $0x234] sm:$0xf0]  ;;  %v2431_v3 = vld [vmem:[%s2939_s27 + $0x238] sm:$0xf0]  ;;  %v2421_v4 = vld [vmem:[%s2939_s27 + $0x190] sm:$0xf] }
 0x311   : > { %2506 = vmatmul.msk.bf16.vlgmr.msrb.gmra.mxu3 %vm1463_vm4, %v3281_v28  ;;  %1655 = vmatpush.bf16.msrb.mxu2 %v2398_v22  ;;  %v2613_v54 = vld [vmem:[%s2939_s27 + $0x22c] sm:$0xf0]  ;;  %v2593_v5 = vld [vmem:[%s2939_s27 + $0x194] sm:$0xf]  ;;  %v2430_v7 = vor.u32 %v2614_v1, %v2429_v0  ;;  %v2434_v8 = vor.u32 %v2594_v2, %v2431_v3  ;;  %v2269_v10 = vld [vmem:[%s2939_s27 + $0x58] sm:$0xf] }
 0x312   : > { %1668 = vmatpush.bf16.msrb.mxu3 %v2402_v23  ;;  %1642 = vmatpush.bf16.msrb.mxu1 %v2394_v29  ;;  %v2423_v6 = vld [vmem:[%s2939_s27 + $0x230] sm:$0xf0]  ;;  %v2422_v9 = vor.u32 %v2613_v54, %v2421_v4  ;;  %v2574_v11 = vld [vmem:[%s2939_s27 + $0xf4] sm:$0xf0]  ;;  %v2554_v12 = vld [vmem:[%s2939_s27 + $0x5c] sm:$0xf] }
 0x313   : > { %v2426_v13 = vor.u32 %v2593_v5, %v2423_v6  ;;  %v2271_v14 = vld [vmem:[%s2939_s27 + $0xf8] sm:$0xf0]  ;;  %v2261_v15 = vld [vmem:[%s2939_s27 + $0x50] sm:$0xf]  ;;  %v2553_v17 = vld [vmem:[%s2939_s27 + $0x54] sm:$0xf]  ;;  %v2270_v19 = vor.u32 %v2574_v11, %v2269_v10 }
 0x314   : > { %1630 = vmatpush.bf16.msrb.mxu0 %v2230_v37  ;;  %v2573_v16 = vld [vmem:[%s2939_s27 + $0xec] sm:$0xf0]  ;;  %v2263_v18 = vld [vmem:[%s2939_s27 + $0xf0] sm:$0xf0]  ;;  %v2274_v20 = vor.u32 %v2554_v12, %v2271_v14  ;;  %v2445_v23 = vld [vmem:[%s2939_s27 + $0x1a8] sm:$0xf] }
 0x315   : > { %1656 = vmatpush.bf16.msrb.mxu2 %v2238_v35  ;;  %v2262_v21 = vor.u32 %v2573_v16, %v2261_v15  ;;  %v2266_v22 = vor.u32 %v2553_v17, %v2263_v18  ;;  %v2616_v24 = vld [vmem:[%s2939_s27 + $0x244] sm:$0xf0]  ;;  %v2596_v25 = vld [vmem:[%s2939_s27 + $0x1ac] sm:$0xf]  ;;  %v2437_v27 = vld [vmem:[%s2939_s27 + $0x1a0] sm:$0xf] }
 0x316   : > { %1669 = vmatpush.bf16.msrb.mxu3 %v2242_v36  ;;  %1643 = vmatpush.bf16.msrb.mxu1 %v2234_v38  ;;  %v2447_v26 = vld [vmem:[%s2939_s27 + $0x248] sm:$0xf0]  ;;  %v2615_v29 = vld [vmem:[%s2939_s27 + $0x23c] sm:$0xf0]  ;;  %v2595_v30 = vld [vmem:[%s2939_s27 + $0x1a4] sm:$0xf]  ;;  %v2446_v32 = vor.u32 %v2616_v24, %v2445_v23 }
 0x317   : > { %v2439_v31 = vld [vmem:[%s2939_s27 + $0x240] sm:$0xf0]  ;;  %v2450_v33 = vor.u32 %v2596_v25, %v2447_v26  ;;  %v2438_v34 = vor.u32 %v2615_v29, %v2437_v27  ;;  %v2285_v35 = vld [vmem:[%s2939_s27 + $0x68] sm:$0xf]  ;;  %v2556_v37 = vld [vmem:[%s2939_s27 + $0x6c] sm:$0xf] }
 0x318   : > { %v2576_v36 = vld [vmem:[%s2939_s27 + $0x104] sm:$0xf0]  ;;  %v2442_v38 = vor.u32 %v2595_v30, %v2439_v31  ;;  %v2287_v41 = vld [vmem:[%s2939_s27 + $0x108] sm:$0xf0]  ;;  %v2277_v42 = vld [vmem:[%s2939_s27 + $0x60] sm:$0xf] }
 0x319   : > { %v2575_v43 = vld [vmem:[%s2939_s27 + $0xfc] sm:$0xf0]  ;;  %v2555_v44 = vld [vmem:[%s2939_s27 + $0x64] sm:$0xf]  ;;  %v2286_v46 = vor.u32 %v2576_v36, %v2285_v35  ;;  %v2290_v47 = vor.u32 %v2556_v37, %v2287_v41  ;;  %v2598_v50 = vld [vmem:[%s2939_s27 + $0x1bc] sm:$0xf] }
 0x31a   : > { %v2279_v45 = vld [vmem:[%s2939_s27 + $0x100] sm:$0xf0]  ;;  %v2278_v39 = vor.u32 %v2575_v43, %v2277_v42  ;;  %v2463_v51 = vld [vmem:[%s2939_s27 + $0x258] sm:$0xf0]  ;;  %v2453_v52 = vld [vmem:[%s2939_s27 + $0x1b0] sm:$0xf] }
 0x31b   : > { %v2597_v55 = vld [vmem:[%s2939_s27 + $0x1b4] sm:$0xf]  ;;  %v2466_v58 = vor.u32 %v2598_v50, %v2463_v51  ;;  %v2303_v0 = vld [vmem:[%s2939_s27 + $0x118] sm:$0xf0]  ;;  %v2293_v1 = vld [vmem:[%s2939_s27 + $0x70] sm:$0xf] }
 0x31c   : > { %v2455_v56 = vld [vmem:[%s2939_s27 + $0x250] sm:$0xf0]  ;;  %v2577_v2 = vld [vmem:[%s2939_s27 + $0x10c] sm:$0xf0]  ;;  %v2600_v10 = vld [vmem:[%s2939_s27 + $0x1cc] sm:$0xf] }
 0x31d   : > { %v2557_v3 = vld [vmem:[%s2939_s27 + $0x74] sm:$0xf]  ;;  %v2294_v6 = vor.u32 %v2577_v2, %v2293_v1  ;;  %v2479_v11 = vld [vmem:[%s2939_s27 + $0x268] sm:$0xf0]  ;;  %v2469_v12 = vld [vmem:[%s2939_s27 + $0x1c0] sm:$0xf] }
 0x31e   : > { %v2295_v4 = vld [vmem:[%s2939_s27 + $0x110] sm:$0xf0]  ;;  %v2599_v14 = vld [vmem:[%s2939_s27 + $0x1c4] sm:$0xf]  ;;  %v2482_v17 = vor.u32 %v2600_v10, %v2479_v11  ;;  %v2319_v23 = vld [vmem:[%s2939_s27 + $0x128] sm:$0xf0] }
 0x31f   : > { %2507 = vmatmul.msk.bf16.vlgmr.msra.gmra.mxu0 %vm1463_vm4, %v3281_v28  ;;  %2508 = vmatmul.msk.bf16.vlgmr.msra.gmra.mxu1 %vm1463_vm4, %v3281_v28  ;;  %v2471_v15 = vld [vmem:[%s2939_s27 + $0x260] sm:$0xf0]  ;;  %v2309_v24 = vld [vmem:[%s2939_s27 + $0x80] sm:$0xf]  ;;  %v2602_v35 = vld [vmem:[%s2939_s27 + $0x1dc] sm:$0xf] }
 0x320   : > { %2509 = vmatmul.msk.bf16.vlgmr.msra.gmra.mxu2 %vm1463_vm4, %v3281_v28  ;;  %1681 = vmatpush.bf16.msra.mxu0 %v2406_v49  ;;  %v2618_v49 = vld [vmem:[%s2939_s27 + $0x254] sm:$0xf0]  ;;  %v2579_v25 = vld [vmem:[%s2939_s27 + $0x11c] sm:$0xf0]  ;;  %v2559_v26 = vld [vmem:[%s2939_s27 + $0x84] sm:$0xf] }
 0x321   : > { %2510 = vmatmul.msk.bf16.vlgmr.msra.gmra.mxu3 %vm1463_vm4, %v3281_v28  ;;  %1707 = vmatpush.bf16.msra.mxu2 %v2414_v40  ;;  %v2282_v40 = vor.u32 %v2555_v44, %v2279_v45  ;;  %v2311_v27 = vld [vmem:[%s2939_s27 + $0x120] sm:$0xf0]  ;;  %v2310_v31 = vor.u32 %v2579_v25, %v2309_v24  ;;  %v2495_v36 = vld [vmem:[%s2939_s27 + $0x278] sm:$0xf0]  ;;  %v2485_v37 = vld [vmem:[%s2939_s27 + $0x1d0] sm:$0xf] }
 0x322   : > { %1720 = vmatpush.bf16.msra.mxu3 %v2418_v48  ;;  %1694 = vmatpush.bf16.msra.mxu1 %v2410_v53  ;;  %v2461_v48 = vld [vmem:[%s2939_s27 + $0x1b8] sm:$0xf]  ;;  %v2617_v53 = vld [vmem:[%s2939_s27 + $0x24c] sm:$0xf0]  ;;  %v2601_v41 = vld [vmem:[%s2939_s27 + $0x1d4] sm:$0xf]  ;;  %v2498_v44 = vor.u32 %v2602_v35, %v2495_v36 }
 0x323   : > { %v2462_v57 = vor.u32 %v2618_v49, %v2461_v48  ;;  %v2454_v59 = vor.u32 %v2617_v53, %v2453_v52  ;;  %v2487_v42 = vld [vmem:[%s2939_s27 + $0x270] sm:$0xf0]  ;;  %v2335_v48 = vld [vmem:[%s2939_s27 + $0x138] sm:$0xf0]  ;;  %v2325_v49 = vld [vmem:[%s2939_s27 + $0x90] sm:$0xf] }
 0x324   : > { %1682 = vmatpush.bf16.msra.mxu0 %v2246_v62  ;;  %v2558_v62 = vld [vmem:[%s2939_s27 + $0x7c] sm:$0xf]  ;;  %v2581_v50 = vld [vmem:[%s2939_s27 + $0x12c] sm:$0xf0]  ;;  %v2561_v51 = vld [vmem:[%s2939_s27 + $0x94] sm:$0xf] }
 0x325   : > { %1708 = vmatpush.bf16.msra.mxu2 %v2254_v60  ;;  %v2301_v60 = vld [vmem:[%s2939_s27 + $0x78] sm:$0xf]  ;;  %v2306_v5 = vor.u32 %v2558_v62, %v2303_v0  ;;  %v2327_v52 = vld [vmem:[%s2939_s27 + $0x130] sm:$0xf0]  ;;  %v974_v24 = vld [vmem:[%s2950_s20 + $0x8] sm:$0xff]  ;;  %s2041_s28 = sshll.u32 %s2952_s21, 4  ;;  %s2042_s28 = int_to_ptr.vmem [resolvable:$true] %s2041_s28 }
 0x326   : > { %1721 = vmatpush.bf16.msra.mxu3 %v2258_v61  ;;  %1695 = vmatpush.bf16.msra.mxu1 %v2250_v63  ;;  %v2578_v61 = vld [vmem:[%s2939_s27 + $0x114] sm:$0xf0]  ;;  %v2458_v63 = vor.u32 %v2597_v55, %v2455_v56  ;;  %v2326_v56 = vor.u32 %v2581_v50, %v2325_v49  ;;  %v991_v25 = vperm.slane %v974_v24, 0  ;;  %v997_v49 = vperm.slane %v974_v24, 6 }
 0x327   : > { %v2302_v54 = vor.u32 %v2578_v61, %v2301_v60  ;;  %v998_v50 = vperm.slane %v974_v24, 7 }
 0x32f   : > { %2511 = vmatmul.msk.bf16.vlgmr.msrb.gmra.mxu0 %vm1463_vm4, %v3281_v28  ;;  %2512 = vmatmul.msk.bf16.vlgmr.msrb.gmra.mxu1 %vm1463_vm4, %v3281_v28 }
 0x330   : > { %2513 = vmatmul.msk.bf16.vlgmr.msrb.gmra.mxu2 %vm1463_vm4, %v3281_v28  ;;  %1733 = vmatpush.bf16.msrb.mxu0 %v2422_v9  ;;  %v2620_v9 = vld [vmem:[%s2939_s27 + $0x264] sm:$0xf0] }
 0x331   : > { %2514 = vmatmul.msk.bf16.vlgmr.msrb.gmra.mxu3 %vm1463_vm4, %v3281_v28  ;;  %1759 = vmatpush.bf16.msrb.mxu2 %v2430_v7  ;;  %v2298_v7 = vor.u32 %v2557_v3, %v2295_v4 }
 0x332   : > { %1772 = vmatpush.bf16.msrb.mxu3 %v2434_v8  ;;  %1746 = vmatpush.bf16.msrb.mxu1 %v2426_v13  ;;  %v2477_v8 = vld [vmem:[%s2939_s27 + $0x1c8] sm:$0xf]  ;;  %v2619_v13 = vld [vmem:[%s2939_s27 + $0x25c] sm:$0xf0] }
 0x333   : > { %v2478_v16 = vor.u32 %v2620_v9, %v2477_v8  ;;  %v2470_v18 = vor.u32 %v2619_v13, %v2469_v12 }
 0x334   : > { %1734 = vmatpush.bf16.msrb.mxu0 %v2262_v21  ;;  %v2560_v21 = vld [vmem:[%s2939_s27 + $0x8c] sm:$0xf] }
 0x335   : > { %1760 = vmatpush.bf16.msrb.mxu2 %v2270_v19  ;;  %v2317_v19 = vld [vmem:[%s2939_s27 + $0x88] sm:$0xf]  ;;  %v2322_v30 = vor.u32 %v2560_v21, %v2319_v23 }
 0x336   : > { %1773 = vmatpush.bf16.msrb.mxu3 %v2274_v20  ;;  %1747 = vmatpush.bf16.msrb.mxu1 %v2266_v22  ;;  %v2580_v20 = vld [vmem:[%s2939_s27 + $0x124] sm:$0xf0]  ;;  %v2474_v22 = vor.u32 %v2599_v14, %v2471_v15 }
 0x337   : > { %v2318_v29 = vor.u32 %v2580_v20, %v2317_v19 }
 0x33f   : > { %2515 = vmatmul.msk.bf16.vlgmr.msra.gmra.mxu0 %vm1463_vm4, %v3281_v28  ;;  %2516 = vmatmul.msk.bf16.vlgmr.msra.gmra.mxu1 %vm1463_vm4, %v3281_v28 }
 0x340   : > { %2517 = vmatmul.msk.bf16.vlgmr.msra.gmra.mxu2 %vm1463_vm4, %v3281_v28  ;;  %1785 = vmatpush.bf16.msra.mxu0 %v2438_v34  ;;  %v2622_v34 = vld [vmem:[%s2939_s27 + $0x274] sm:$0xf0] }
 0x341   : > { %2518 = vmatmul.msk.bf16.vlgmr.msra.gmra.mxu3 %vm1463_vm4, %v3281_v28  ;;  %1811 = vmatpush.bf16.msra.mxu2 %v2446_v32  ;;  %v2314_v32 = vor.u32 %v2559_v26, %v2311_v27  ;;  %v992_v26 = vperm.slane %v974_v24, 1 }
 0x342   : > { %1824 = vmatpush.bf16.msra.mxu3 %v2450_v33  ;;  %1798 = vmatpush.bf16.msra.mxu1 %v2442_v38  ;;  %v2493_v33 = vld [vmem:[%s2939_s27 + $0x1d8] sm:$0xf]  ;;  %v2621_v38 = vld [vmem:[%s2939_s27 + $0x26c] sm:$0xf0] }
 0x343   : > { %v2494_v43 = vor.u32 %v2622_v34, %v2493_v33  ;;  %v2486_v45 = vor.u32 %v2621_v38, %v2485_v37  ;;  %v993_v33 = vperm.slane %v974_v24, 2  ;;  %v994_v34 = vperm.slane %v974_v24, 3 }
 0x344   : > { %1786 = vmatpush.bf16.msra.mxu0 %v2278_v39  ;;  %v2562_v39 = vld [vmem:[%s2939_s27 + $0x9c] sm:$0xf] }
 0x345   : > { %1812 = vmatpush.bf16.msra.mxu2 %v2286_v46  ;;  %v2333_v46 = vld [vmem:[%s2939_s27 + $0x98] sm:$0xf]  ;;  %v2338_v55 = vor.u32 %v2562_v39, %v2335_v48 }
 0x346   : > { %1825 = vmatpush.bf16.msra.mxu3 %v2290_v47  ;;  %1799 = vmatpush.bf16.msra.mxu1 %v2282_v40  ;;  %v2582_v47 = vld [vmem:[%s2939_s27 + $0x134] sm:$0xf0]  ;;  %v2490_v40 = vor.u32 %v2601_v41, %v2487_v42  ;;  %s2623_s27 = smul.u32 320, %s2878_s17  ;;  %s2028_s17 = scalar_lea.sflag [#allocation5], %s2935_s11 }
 0x347   : > { %v2334_v53 = vor.u32 %v2582_v47, %v2333_v46 }
 0x348   : > { %s2039_s26 = scalar_lea.hbm %s3623_s29, %s2623_s27 }
 0x349   : > { %s2043_s15 = sshll.u32 %s2039_s26, 4  ;;  %s2044_s15 = int_to_ptr.hbm [resolvable:$true] %s2043_s15 }
 0x34a   : > { %s2725_s19 = sshra.s32 %s2044_s15, 4  ;;  %s2726_s19 = int_to_ptr.hbm [resolvable:$true] %s2725_s19 }
 0x34b   : > { %s2727_s14 = scalar_lea.hbm %s2726_s19, 320  ;;  %p2732_p5 = scmp.lt.s32.totalorder %s2726_s19, %s3624_s23 }
 0x34c   : > { %p2728_p6 = scmp.ne.s32.totalorder %s2726_s19, %s2727_s14 }
 0x34e   : > { %p2729_p3 = pnand %p2728_p6, %p2903_p11 }
 0x34f   : > { %2519 = vmatmul.msk.bf16.vlgmr.msrb.gmra.mxu0 %vm1463_vm4, %v3281_v28  ;;  %2520 = vmatmul.msk.bf16.vlgmr.msrb.gmra.mxu1 %vm1463_vm4, %v3281_v28 }
 0x350   : > { %2521 = vmatmul.msk.bf16.vlgmr.msrb.gmra.mxu2 %vm1463_vm4, %v3281_v28  ;;  %1837 = vmatpush.bf16.msrb.mxu0 %v2454_v59  ;;  %p2730_p4 = pneg %p2729_p3 }
 0x351   : > { %2522 = vmatmul.msk.bf16.vlgmr.msrb.gmra.mxu3 %vm1463_vm4, %v3281_v28  ;;  %1863 = vmatpush.bf16.msrb.mxu2 %v2462_v57  ;;  %v2330_v57 = vor.u32 %v2561_v51, %v2327_v52 }
 0x352   : > { %1876 = vmatpush.bf16.msrb.mxu3 %v2466_v58  ;;  %1850 = vmatpush.bf16.msrb.mxu1 %v2458_v63  ;;  %v973_v58 = vld [vmem:[%s2950_s20] sm:$0xff] }
 0x353   : > { %v983_v59 = vperm.slane %v973_v58, 0  ;;  %v984_v60 = vperm.slane %v973_v58, 1  ;;  %v985_v1 = vperm.slane %v973_v58, 2  ;;  %v986_v2 = vperm.slane %v973_v58, 3 }
 0x354   : > { %1838 = vmatpush.bf16.msrb.mxu0 %v2294_v6  ;;  %v987_v8 = vperm.slane %v973_v58, 4  ;;  %v988_v9 = vperm.slane %v973_v58, 5 }
 0x355   : > { %1864 = vmatpush.bf16.msrb.mxu2 %v2302_v54 }
 0x356   : > { %1877 = vmatpush.bf16.msrb.mxu3 %v2306_v5  ;;  %1851 = vmatpush.bf16.msrb.mxu1 %v2298_v7 }
 0x35f   : > { %2523 = vmatmul.msk.bf16.vlgmr.msra.gmra.mxu0 %vm1463_vm4, %v3281_v28  ;;  %2524 = vmatmul.msk.bf16.vlgmr.msra.gmra.mxu1 %vm1463_vm4, %v3281_v28 }
 0x360   : > { %2525 = vmatmul.msk.bf16.vlgmr.msra.gmra.mxu2 %vm1463_vm4, %v3281_v28  ;;  %1889 = vmatpush.bf16.msra.mxu0 %v2470_v18 }
 0x361   : > { %2526 = vmatmul.msk.bf16.vlgmr.msra.gmra.mxu3 %vm1463_vm4, %v3281_v28  ;;  %1915 = vmatpush.bf16.msra.mxu2 %v2478_v16  ;;  %v989_v16 = vperm.slane %v973_v58, 6 }
 0x362   : > { %1928 = vmatpush.bf16.msra.mxu3 %v2482_v17  ;;  %1902 = vmatpush.bf16.msra.mxu1 %v2474_v22  ;;  %v990_v17 = vperm.slane %v973_v58, 7  ;;  %v975_v58 = vld [vmem:[%s2950_s20 + $0x10] sm:$0xff] }
 0x364   : > { %1890 = vmatpush.bf16.msra.mxu0 %v2310_v31 }
 0x365   : > { %1916 = vmatpush.bf16.msra.mxu2 %v2318_v29 }
 0x366   : > { %1929 = vmatpush.bf16.msra.mxu3 %v2322_v30  ;;  %1903 = vmatpush.bf16.msra.mxu1 %v2314_v32 }
 0x36f   : > { %2527 = vmatmul.msk.bf16.vlgmr.msrb.gmra.mxu0 %vm1463_vm4, %v3281_v28  ;;  %2528 = vmatmul.msk.bf16.vlgmr.msrb.gmra.mxu1 %vm1463_vm4, %v3281_v28 }
 0x370   : > { %2529 = vmatmul.msk.bf16.vlgmr.msrb.gmra.mxu2 %vm1463_vm4, %v3281_v28  ;;  %1941 = vmatpush.bf16.msrb.mxu0 %v2486_v45 }
 0x371   : > { %2530 = vmatmul.msk.bf16.vlgmr.msrb.gmra.mxu3 %vm1463_vm4, %v3281_v28  ;;  %1967 = vmatpush.bf16.msrb.mxu2 %v2494_v43  ;;  %v995_v43 = vperm.slane %v974_v24, 4 }
 0x372   : > { %1980 = vmatpush.bf16.msrb.mxu3 %v2498_v44  ;;  %1954 = vmatpush.bf16.msrb.mxu1 %v2490_v40  ;;  %v996_v44 = vperm.slane %v974_v24, 5 }
 0x374   : > { %1942 = vmatpush.bf16.msrb.mxu0 %v2326_v56 }
 0x375   : > { %1968 = vmatpush.bf16.msrb.mxu2 %v2334_v53 }
 0x376   : > { %1981 = vmatpush.bf16.msrb.mxu3 %v2338_v55  ;;  %1955 = vmatpush.bf16.msrb.mxu1 %v2330_v57 }
 0x37c   : > { %v1476_v61 = vpop.f32.mrf.mxu0  ;;  %v1489_v63 = vpop.f32.mrf.mxu1 }
 0x37d   : > { %v1477_v62 = vadd.f32 %v1476_v61, %v983_v59  ;;  %v1490_v0 = vadd.f32 %v1489_v63, %v984_v60  ;;  %v999_v59 = vperm.slane %v975_v58, 0  ;;  %v1000_v60 = vperm.slane %v975_v58, 1 }
 0x37f   : > { %1987 = vst [vmem:[%s2952_s21] sm:$0xff] %v1477_v62  ;;  %2531 = vmatmul.msk.bf16.vlgmr.msra.gmra.mxu0 %vm1463_vm4, %v3281_v28  ;;  %2532 = vmatmul.msk.bf16.vlgmr.msra.gmra.mxu1 %vm1463_vm4, %v3281_v28 }
 0x380   : > { %1988 = vst [vmem:[%s2952_s21 + $0x8] sm:$0xff] %v1490_v0  ;;  %2533 = vmatmul.msk.bf16.vlgmr.msra.gmra.mxu2 %vm1463_vm4, %v3281_v28 }
 0x381   : > { %2534 = vmatmul.msk.bf16.vlgmr.msra.gmra.mxu3 %vm1463_vm4, %v3281_v28 }
 0x383   : > { %v1502_v3 = vpop.f32.mrf.mxu2 }
 0x384   : > { %v1503_v4 = vadd.f32 %v1502_v3, %v985_v1  ;;  %v1515_v54 = vpop.f32.mrf.mxu3  ;;  %v1478_v5 = vpop.f32.mrf.mxu0  ;;  %v1001_v3 = vperm.slane %v975_v58, 2 }
 0x385   : > { %v1516_v6 = vadd.f32 %v1515_v54, %v986_v2  ;;  %v1491_v7 = vpop.f32.mrf.mxu1 }
 0x386   : > { %1989 = vst [vmem:[%s2952_s21 + $0x10] sm:$0xff] %v1503_v4  ;;  %v1002_v4 = vperm.slane %v975_v58, 3 }
 0x387   : > { %1990 = vst [vmem:[%s2952_s21 + $0x18] sm:$0xff] %v1516_v6 }
 0x38b   : > { %v1504_v10 = vpop.f32.mrf.mxu2 }
 0x38c   : > { %v1517_v11 = vpop.f32.mrf.mxu3  ;;  %v1528_v12 = vpop.f32.mrf.mxu0  ;;  %v1003_v10 = vperm.slane %v975_v58, 4 }
 0x38d   : > { %v1529_v13 = vadd.f32 %v1528_v12, %v987_v8  ;;  %v1541_v14 = vpop.f32.mrf.mxu1  ;;  %v1004_v11 = vperm.slane %v975_v58, 5 }
 0x38e   : > { %v1542_v15 = vadd.f32 %v1541_v14, %v988_v9 }
 0x38f   : > { %1991 = vst [vmem:[%s2952_s21 + $0x20] sm:$0xff] %v1529_v13  ;;  %2535 = vmatmul.msk.bf16.vlgmr.msrb.gmra.mxu0 %vm1463_vm4, %v3281_v28  ;;  %2536 = vmatmul.msk.bf16.vlgmr.msrb.gmra.mxu1 %vm1463_vm4, %v3281_v28 }
 0x390   : > { %1992 = vst [vmem:[%s2952_s21 + $0x28] sm:$0xff] %v1542_v15  ;;  %2537 = vmatmul.msk.bf16.vlgmr.msrb.gmra.mxu2 %vm1463_vm4, %v3281_v28 }
 0x391   : > { %2538 = vmatmul.msk.bf16.vlgmr.msrb.gmra.mxu3 %vm1463_vm4, %v3281_v28 }
 0x393   : > { %v1554_v18 = vpop.f32.mrf.mxu2 }
 0x394   : > { %v1555_v19 = vadd.f32 %v1554_v18, %v989_v16  ;;  %v1567_v20 = vpop.f32.mrf.mxu3  ;;  %v1530_v21 = vpop.f32.mrf.mxu0  ;;  %v1005_v18 = vperm.slane %v975_v58, 6 }
 0x395   : > { %v1568_v22 = vadd.f32 %v1567_v20, %v990_v17  ;;  %v1543_v23 = vpop.f32.mrf.mxu1 }
 0x396   : > { %1993 = vst [vmem:[%s2952_s21 + $0x30] sm:$0xff] %v1555_v19  ;;  %v1006_v19 = vperm.slane %v975_v58, 7 }
 0x397   : > { %1994 = vst [vmem:[%s2952_s21 + $0x38] sm:$0xff] %v1568_v22 }
 0x39b   : > { %v1556_v27 = vpop.f32.mrf.mxu2 }
 0x39c   : > { %v1569_v29 = vpop.f32.mrf.mxu3  ;;  %v1580_v30 = vpop.f32.mrf.mxu0 }
 0x39d   : > { %v1581_v28 = vadd.f32 %v1580_v30, %v991_v25  ;;  %v1593_v31 = vpop.f32.mrf.mxu1 }
 0x39e   : > { %v1594_v32 = vadd.f32 %v1593_v31, %v992_v26  ;;  %v976_v26 = vld [vmem:[%s2950_s20 + $0x18] sm:$0xff] }
 0x39f   : > { %1995 = vst [vmem:[%s2952_s21 + $0x40] sm:$0xff] %v1581_v28  ;;  %v1007_v27 = vperm.slane %v976_v26, 0  ;;  %v1008_v29 = vperm.slane %v976_v26, 1 }
 0x3a0   : > { %1996 = vst [vmem:[%s2952_s21 + $0x48] sm:$0xff] %v1594_v32 }
 0x3a3   : > { %v1606_v35 = vpop.f32.mrf.mxu2 }
 0x3a4   : > { %v1607_v36 = vadd.f32 %v1606_v35, %v993_v33  ;;  %v1619_v37 = vpop.f32.mrf.mxu3  ;;  %v1582_v38 = vpop.f32.mrf.mxu0  ;;  %v1009_v35 = vperm.slane %v976_v26, 2 }
 0x3a5   : > { %v1620_v41 = vadd.f32 %v1619_v37, %v994_v34  ;;  %v1595_v42 = vpop.f32.mrf.mxu1 }
 0x3a6   : > { %1997 = vst [vmem:[%s2952_s21 + $0x50] sm:$0xff] %v1607_v36  ;;  %v1010_v36 = vperm.slane %v976_v26, 3 }
 0x3a7   : > { %1998 = vst [vmem:[%s2952_s21 + $0x58] sm:$0xff] %v1620_v41 }
 0x3ab   : > { %v1608_v45 = vpop.f32.mrf.mxu2 }
 0x3ac   : > { %v1621_v46 = vpop.f32.mrf.mxu3  ;;  %v1632_v47 = vpop.f32.mrf.mxu0  ;;  %v1011_v45 = vperm.slane %v976_v26, 4 }
 0x3ad   : > { %v1633_v39 = vadd.f32 %v1632_v47, %v995_v43  ;;  %v1645_v40 = vpop.f32.mrf.mxu1  ;;  %v1012_v46 = vperm.slane %v976_v26, 5 }
 0x3ae   : > { %v1646_v48 = vadd.f32 %v1645_v40, %v996_v44 }
 0x3af   : > { %1999 = vst [vmem:[%s2952_s21 + $0x60] sm:$0xff] %v1633_v39 }
 0x3b0   : > { %2000 = vst [vmem:[%s2952_s21 + $0x68] sm:$0xff] %v1646_v48 }
 0x3b3   : > { %v1658_v51 = vpop.f32.mrf.mxu2 }
 0x3b4   : > { %v1659_v52 = vadd.f32 %v1658_v51, %v997_v49  ;;  %v1671_v53 = vpop.f32.mrf.mxu3  ;;  %v1634_v55 = vpop.f32.mrf.mxu0  ;;  %v1013_v51 = vperm.slane %v976_v26, 6 }
 0x3b5   : > { %v1672_v56 = vadd.f32 %v1671_v53, %v998_v50  ;;  %v1647_v57 = vpop.f32.mrf.mxu1 }
 0x3b6   : > { %2001 = vst [vmem:[%s2952_s21 + $0x70] sm:$0xff] %v1659_v52  ;;  %v1014_v52 = vperm.slane %v976_v26, 7 }
 0x3b7   : > { %2002 = vst [vmem:[%s2952_s21 + $0x78] sm:$0xff] %v1672_v56 }
 0x3bb   : > { %v1660_v61 = vpop.f32.mrf.mxu2 }
 0x3bc   : > { %v1673_v62 = vpop.f32.mrf.mxu3  ;;  %v1684_v63 = vpop.f32.mrf.mxu0 }
 0x3bd   : > { %v1685_v0 = vadd.f32 %v1684_v63, %v999_v59  ;;  %v1697_v1 = vpop.f32.mrf.mxu1 }
 0x3be   : > { %v1698_v2 = vadd.f32 %v1697_v1, %v1000_v60  ;;  %v977_v60 = vld [vmem:[%s2950_s20 + $0x20] sm:$0xff]  ;;  %s2731_s20 = scalar_lea.hbm %s3624_s23, 640 }
 0x3bf   : > { %2003 = vst [vmem:[%s2952_s21 + $0x80] sm:$0xff] %v1685_v0  ;;  %v1015_v61 = vperm.slane %v977_v60, 0  ;;  %v1016_v62 = vperm.slane %v977_v60, 1  ;;  %p2733_p7 = scmp.lt.s32.totalorder %s2731_s20, %s2727_s14 }
 0x3c0   : > { %2004 = vst [vmem:[%s2952_s21 + $0x88] sm:$0xff] %v1698_v2 }
 0x3c1   : > { %p2734_p8 = por %p2733_p7, %p2732_p5 }
 0x3c3   : > { %v1710_v54 = vpop.f32.mrf.mxu2  ;;  %p2735_p10 = pnand %p2734_p8, %p2730_p4 }
 0x3c4   : > { %v1711_v5 = vadd.f32 %v1710_v54, %v1001_v3  ;;  %v1723_v6 = vpop.f32.mrf.mxu3  ;;  %v1686_v7 = vpop.f32.mrf.mxu0  ;;  %v1017_v54 = vperm.slane %v977_v60, 2 }
 0x3c5   : > { %v1724_v8 = vadd.f32 %v1723_v6, %v1002_v4  ;;  %v1699_v9 = vpop.f32.mrf.mxu1 }
 0x3c6   : > { %2005 = vst [vmem:[%s2952_s21 + $0x90] sm:$0xff] %v1711_v5  ;;  %v1018_v5 = vperm.slane %v977_v60, 3 }
 0x3c7   : > { %2006 = vst [vmem:[%s2952_s21 + $0x98] sm:$0xff] %v1724_v8 }
 0x3cb   : > { %v1712_v12 = vpop.f32.mrf.mxu2 }
 0x3cc   : > { %v1725_v13 = vpop.f32.mrf.mxu3  ;;  %v1736_v14 = vpop.f32.mrf.mxu0  ;;  %v1019_v12 = vperm.slane %v977_v60, 4 }
 0x3cd   : > { %v1737_v15 = vadd.f32 %v1736_v14, %v1003_v10  ;;  %v1749_v16 = vpop.f32.mrf.mxu1  ;;  %v1020_v13 = vperm.slane %v977_v60, 5 }
 0x3ce   : > { %v1750_v17 = vadd.f32 %v1749_v16, %v1004_v11 }
 0x3cf   : > { %2007 = vst [vmem:[%s2952_s21 + $0xa0] sm:$0xff] %v1737_v15 }
 0x3d0   : > { %2008 = vst [vmem:[%s2952_s21 + $0xa8] sm:$0xff] %v1750_v17 }
 0x3d3   : > { %v1762_v20 = vpop.f32.mrf.mxu2 }
 0x3d4   : > { %v1763_v21 = vadd.f32 %v1762_v20, %v1005_v18  ;;  %v1775_v22 = vpop.f32.mrf.mxu3  ;;  %v1738_v23 = vpop.f32.mrf.mxu0  ;;  %v1021_v20 = vperm.slane %v977_v60, 6 }
 0x3d5   : > { %v1776_v24 = vadd.f32 %v1775_v22, %v1006_v19  ;;  %v1751_v25 = vpop.f32.mrf.mxu1 }
 0x3d6   : > { %2009 = vst [vmem:[%s2952_s21 + $0xb0] sm:$0xff] %v1763_v21  ;;  %v1022_v21 = vperm.slane %v977_v60, 7 }
 0x3d7   : > { %2010 = vst [vmem:[%s2952_s21 + $0xb8] sm:$0xff] %v1776_v24 }
 0x3db   : > { %v1764_v30 = vpop.f32.mrf.mxu2 }
 0x3dc   : > { %v1777_v28 = vpop.f32.mrf.mxu3  ;;  %v1788_v31 = vpop.f32.mrf.mxu0 }
 0x3dd   : > { %v1789_v32 = vadd.f32 %v1788_v31, %v1007_v27  ;;  %v1801_v33 = vpop.f32.mrf.mxu1 }
 0x3de   : > { %v1802_v34 = vadd.f32 %v1801_v33, %v1008_v29 }
 0x3df   : > { %2011 = vst [vmem:[%s2952_s21 + $0xc0] sm:$0xff] %v1789_v32 }
 0x3e0   : > { %2012 = vst [vmem:[%s2952_s21 + $0xc8] sm:$0xff] %v1802_v34 }
 0x3e3   : > { %v1814_v37 = vpop.f32.mrf.mxu2 }
 0x3e4   : > { %v1815_v38 = vadd.f32 %v1814_v37, %v1009_v35  ;;  %v1827_v41 = vpop.f32.mrf.mxu3  ;;  %v1790_v42 = vpop.f32.mrf.mxu0 }
 0x3e5   : > { %v1828_v43 = vadd.f32 %v1827_v41, %v1010_v36  ;;  %v1803_v44 = vpop.f32.mrf.mxu1 }
 0x3e6   : > { %2013 = vst [vmem:[%s2952_s21 + $0xd0] sm:$0xff] %v1815_v38 }
 0x3e7   : > { %2014 = vst [vmem:[%s2952_s21 + $0xd8] sm:$0xff] %v1828_v43 }
 0x3eb   : > { %v1816_v47 = vpop.f32.mrf.mxu2 }
 0x3ec   : > { %v1829_v39 = vpop.f32.mrf.mxu3  ;;  %v1840_v40 = vpop.f32.mrf.mxu0 }
 0x3ed   : > { %v1841_v48 = vadd.f32 %v1840_v40, %v1011_v45  ;;  %v1853_v49 = vpop.f32.mrf.mxu1 }
 0x3ee   : > { %v1854_v50 = vadd.f32 %v1853_v49, %v1012_v46 }
 0x3ef   : > { %2015 = vst [vmem:[%s2952_s21 + $0xe0] sm:$0xff] %v1841_v48 }
 0x3f0   : > { %2016 = vst [vmem:[%s2952_s21 + $0xe8] sm:$0xff] %v1854_v50 }
 0x3f3   : > { %v1866_v53 = vpop.f32.mrf.mxu2 }
 0x3f4   : > { %v1867_v55 = vadd.f32 %v1866_v53, %v1013_v51  ;;  %v1879_v56 = vpop.f32.mrf.mxu3  ;;  %v1842_v57 = vpop.f32.mrf.mxu0 }
 0x3f5   : > { %v1880_v58 = vadd.f32 %v1879_v56, %v1014_v52  ;;  %v1855_v59 = vpop.f32.mrf.mxu1 }
 0x3f6   : > { %2017 = vst [vmem:[%s2952_s21 + $0xf0] sm:$0xff] %v1867_v55 }
 0x3f7   : > { %2018 = vst [vmem:[%s2952_s21 + $0xf8] sm:$0xff] %v1880_v58 }
 0x3fb   : > { %v1868_v63 = vpop.f32.mrf.mxu2 }
 0x3fc   : > { %v1881_v0 = vpop.f32.mrf.mxu3  ;;  %v1892_v1 = vpop.f32.mrf.mxu0 }
 0x3fd   : > { %v1893_v2 = vadd.f32 %v1892_v1, %v1015_v61  ;;  %v1905_v3 = vpop.f32.mrf.mxu1 }
 0x3fe   : > { %v1906_v4 = vadd.f32 %v1905_v3, %v1016_v62 }
 0x3ff   : > { %2019 = vst [vmem:[%s2952_s21 + $0x100] sm:$0xff] %v1893_v2 }
 0x400   : > { %2020 = vst [vmem:[%s2952_s21 + $0x108] sm:$0xff] %v1906_v4 }
 0x403   : > { %v1918_v6 = vpop.f32.mrf.mxu2 }
 0x404   : > { %v1919_v7 = vadd.f32 %v1918_v6, %v1017_v54  ;;  %v1931_v8 = vpop.f32.mrf.mxu3  ;;  %v1894_v9 = vpop.f32.mrf.mxu0 }
 0x405   : > { %v1932_v10 = vadd.f32 %v1931_v8, %v1018_v5  ;;  %v1907_v11 = vpop.f32.mrf.mxu1 }
 0x406   : > { %2021 = vst [vmem:[%s2952_s21 + $0x110] sm:$0xff] %v1919_v7 }
 0x407   : > { %2022 = vst [vmem:[%s2952_s21 + $0x118] sm:$0xff] %v1932_v10 }
 0x40b   : > { %v1920_v14 = vpop.f32.mrf.mxu2 }
 0x40c   : > { %v1933_v15 = vpop.f32.mrf.mxu3  ;;  %v1944_v16 = vpop.f32.mrf.mxu0 }
 0x40d   : > { %v1945_v17 = vadd.f32 %v1944_v16, %v1019_v12  ;;  %v1957_v18 = vpop.f32.mrf.mxu1 }
 0x40e   : > { %v1958_v19 = vadd.f32 %v1957_v18, %v1020_v13 }
 0x40f   : > { %2023 = vst [vmem:[%s2952_s21 + $0x120] sm:$0xff] %v1945_v17 }
 0x410   : > { %2024 = vst [vmem:[%s2952_s21 + $0x128] sm:$0xff] %v1958_v19 }
 0x413   : > { %v1970_v22 = vpop.f32.mrf.mxu2 }
 0x414   : > { %v1971_v23 = vadd.f32 %v1970_v22, %v1021_v20  ;;  %v1983_v24 = vpop.f32.mrf.mxu3  ;;  %v1946_v25 = vpop.f32.mrf.mxu0 }
 0x415   : > { %v1984_v26 = vadd.f32 %v1983_v24, %v1022_v21  ;;  %v1959_v27 = vpop.f32.mrf.mxu1 }
 0x416   : > { %2025 = vst [vmem:[%s2952_s21 + $0x130] sm:$0xff] %v1971_v23 }
 0x417   : > { %2026 = vst [vmem:[%s2952_s21 + $0x138] sm:$0xff] %v1984_v26 }
 0x418   : > { %2738 = shalt.err (!%p2735_p10)
}
 0x419   : > { %2629 = dma.vmem_to_hbm [thread:$0]  (%p2903_p11), %s2042_s28, 5120, %s2044_s15, %s2028_s17  }
 0x41b   : > { %v1972_v29 = vpop.f32.mrf.mxu2 }
 0x41c   : > { %v1985_v30 = vpop.f32.mrf.mxu3 }
 0x41d PF: > { %s3626_s11 = sld [smem:[#allocation9_spill]]  ;;  %p2636_p1 = pnand %p2125_p9, %p2907_p12 }
 0x41f   : > { %p2637_p2 = pneg %p2636_p1 }
 0x423   : > { %s2055_s26 = sand.u32 1, %s3626_s11  }
 0x424   : > { %s2056_s24 = scalar_lea.sflag [#allocation5], %s2055_s26 }
 0x425   : > { %2760 = dma.done.wait (%p2637_p2), %s2056_s24, 5120  }
 0x426   : > { %2762 = vsyncadd (%p2637_p2), %s2056_s24, 4294962176  ;;  %s3628_s16 = sld [smem:[#allocation11_spill]]  ;;  %s3631_s29 = smov %s2769_s30 }
 0x427   : > { %s3629_s19 = sld [smem:[#allocation10_spill]] }
 0x428   : > { %s3630_s15 = sld [smem:[#allocation12_spill]] }
 0x42c   : > { %p27_p11 = scmp.ge.s32.totalorder %s3628_s16, 4  }
 0x42d   : > { %s3632_s30 = smov %s3629_s19 }
 0x42e   :  { %29 = sbr.rel (!%p27_p11) target bundleno = 8 (0x8), region = 134 }
 0x433   :  { %2062 = vsyncpa [#allocation4], 1 }
 0x434   :  { %2064 = vsyncpa [#allocation4 + $0x1], 1 }
 0x435   :  { %2065 = vsyncpa [#allocation5], 1 }
 0x436   :  { %2067 = vsyncpa [#allocation5 + $0x1], 1 }

</bundles_post_ra>
